<compile_context>
chip_gen: v7x
topology: tpu7x:2x2x1
jax: 0.10.0
libtpu: 0.0.40
codegen_flags: <defaults>
</compile_context>

<pallas_src>
import jax
import jax.numpy as jnp
from jax import lax
from jax.experimental import pallas as pl
from jax.experimental.pallas import tpu as pltpu


def _lstm_kernel(x_ref, len_ref,
                 wih0_ref, whh0_ref, b0_ref,
                 w1_ref, b1_ref,
                 wfc_ref, bfc_ref,
                 logits_ref, hn_ref, cn_ref,
                 xg_ref, hseq_ref):
    TB, H4 = xg_ref.shape
    Bp = len_ref.shape[0]
    H = H4 // 4
    T = TB // Bp

    # ---- hoisted layer-0 input projection for ALL timesteps (one batched matmul) ----
    xg_ref[...] = (jnp.dot(x_ref[...], wih0_ref[...],
                           preferred_element_type=jnp.float32) + b0_ref[...])

    lengths = len_ref[...]                               # (Bp, 1) int32, loaded once

    whh0 = whh0_ref[...]                                 # (H, 4H)
    w1 = w1_ref[...]                                     # (2H, 4H) = [W_ih1; W_hh1]
    b1 = b1_ref[...]                                     # (1, 4H)

    def step(t, state):
        # fused state layout along lanes: [h0 | c0 | h1 | c1], shape (Bp, 4H)
        h0 = state[:, 0 * H:1 * H]
        c0 = state[:, 1 * H:2 * H]
        h1 = state[:, 2 * H:3 * H]
        c1 = state[:, 3 * H:4 * H]
        mask = t < lengths                               # (Bp, 1) bool

        row = pl.multiple_of(t * Bp, Bp)

        # ---- layer 0 (input projection already hoisted; only h @ Whh on the path) ----
        g0 = xg_ref[pl.ds(row, Bp), :] + jnp.dot(h0, whh0,
                                                 preferred_element_type=jnp.float32)
        i0 = jax.nn.sigmoid(g0[:, 0 * H:1 * H])
        f0 = jax.nn.sigmoid(g0[:, 1 * H:2 * H])
        gg0 = jnp.tanh(g0[:, 2 * H:3 * H])
        o0 = jax.nn.sigmoid(g0[:, 3 * H:4 * H])
        c0n = f0 * c0 + i0 * gg0
        h0n = o0 * jnp.tanh(c0n)

        # ---- layer 1: single fused [h0n, h1] @ [W_ih1; W_hh1] matmul ----
        g1 = (jnp.dot(jnp.concatenate([h0n, h1], axis=1), w1,
                      preferred_element_type=jnp.float32) + b1)
        i1 = jax.nn.sigmoid(g1[:, 0 * H:1 * H])
        f1 = jax.nn.sigmoid(g1[:, 1 * H:2 * H])
        gg1 = jnp.tanh(g1[:, 2 * H:3 * H])
        o1 = jax.nn.sigmoid(g1[:, 3 * H:4 * H])
        c1n = f1 * c1 + i1 * gg1
        h1n = o1 * jnp.tanh(c1n)

        # single full-vreg masked update of all four states (freeze past length)
        new_state = jnp.concatenate([h0n, c0n, h1n, c1n], axis=1)    # (Bp, 4H)
        state = jnp.where(mask, new_state, state)

        # padded positions produce zero output (pad_packed_sequence semantics)
        hseq_ref[pl.ds(row, Bp), :] = jnp.where(mask, h1n, jnp.zeros_like(h1n))
        return state

    state0 = jnp.zeros((Bp, 4 * H), jnp.float32)
    # TODO(synk): optional non-None initial hidden state (torch `hidden` arg) is not
    # plumbed into the kernel; only the default hidden=None path is implemented.
    state = lax.fori_loop(0, T, step, state0, unroll=True)

    # ---- hoisted logits projection over ALL timesteps (one batched, lane-dense matmul) ----
    logits_ref[...] = (jnp.dot(hseq_ref[...], wfc_ref[...],
                               preferred_element_type=jnp.float32) + bfc_ref[...])

    # final hidden/cell state, written once (state at t = length-1 due to masking)
    hn_ref[0] = state[:, 0 * H:1 * H]
    hn_ref[1] = state[:, 2 * H:3 * H]
    cn_ref[0] = state[:, 1 * H:2 * H]
    cn_ref[1] = state[:, 3 * H:4 * H]


def rnn_forward(params, input_sequences, input_sequences_conditions, input_sequences_lengths):
    # input_sequences:            (T, B) int32
    # input_sequences_conditions: (T, B) int32
    # input_sequences_lengths:    (B,)   int32  (sorted descending, max == T)
    T, B = input_sequences.shape
    H = params["char_emb"].shape[1]
    C = params["w_fc"].shape[0]

    Bp = ((B + 7) // 8) * 8          # pad batch to sublane multiple
    Cp = ((C + 127) // 128) * 128    # pad classes to lane multiple (lane-dense store)

    # --- glue: embedding gathers + concat (plain JAX) ---
    chars_enc = params["char_emb"][input_sequences]                 # (T, B, H)
    conds_enc = params["cond_emb"][input_sequences_conditions]      # (T, B, H)
    x = jnp.concatenate([chars_enc, conds_enc], axis=2).astype(jnp.float32)   # (T, B, 2H)
    if Bp != B:
        x = jnp.pad(x, ((0, 0), (0, Bp - B), (0, 0)))
    x_flat = x.reshape(T * Bp, 2 * H)                               # time-major rows

    lengths = input_sequences_lengths.astype(jnp.int32)
    lengths_p = jnp.pad(lengths, (0, Bp - B)).reshape(Bp, 1)        # padded rows: len 0

    # pre-transpose weights / combine biases / fuse layer-1 weights (glue)
    wih0_t = params["w_ih_l0"].T                                    # (2H, 4H)
    whh0_t = params["w_hh_l0"].T                                    # (H, 4H)
    b0 = (params["b_ih_l0"] + params["b_hh_l0"]).reshape(1, 4 * H)
    w1cat_t = jnp.concatenate([params["w_ih_l1"].T,                 # (2H, 4H)
                               params["w_hh_l1"].T], axis=0)
    b1 = (params["b_ih_l1"] + params["b_hh_l1"]).reshape(1, 4 * H)
    wfc_t = jnp.pad(params["w_fc"].T, ((0, 0), (0, Cp - C)))        # (H, Cp)
    bfc = jnp.pad(params["b_fc"], (0, Cp - C)).reshape(1, Cp)       # (1, Cp)

    full = lambda shape: pl.BlockSpec(shape, lambda i, _s=len(shape): (0,) * _s)

    logits_tm, h_n_p, c_n_p = pl.pallas_call(
        _lstm_kernel,
        out_shape=(
            jax.ShapeDtypeStruct((T * Bp, Cp), jnp.float32),        # time-major logits
            jax.ShapeDtypeStruct((2, Bp, H), jnp.float32),
            jax.ShapeDtypeStruct((2, Bp, H), jnp.float32),
        ),
        grid_spec=pltpu.PrefetchScalarGridSpec(
            num_scalar_prefetch=0,
            grid=(1,),
            in_specs=[
                full((T * Bp, 2 * H)),   # x (all timesteps, VMEM-resident)
                full((Bp, 1)),           # lengths
                full((2 * H, 4 * H)),    # W_ih l0 (transposed)
                full((H, 4 * H)),        # W_hh l0 (transposed)
                full((1, 4 * H)),        # b l0
                full((2 * H, 4 * H)),    # [W_ih l1; W_hh l1] (transposed, fused)
                full((1, 4 * H)),        # b l1
                full((H, Cp)),           # W_fc (transposed, lane-padded)
                full((1, Cp)),           # b_fc (lane-padded)
            ],
            out_specs=[
                full((T * Bp, Cp)),      # logits (lane-dense)
                full((2, Bp, H)),        # h_n
                full((2, Bp, H)),        # c_n
            ],
            scratch_shapes=[
                pltpu.VMEM((T * Bp, 4 * H), jnp.float32),   # hoisted x @ W_ih0 + b0
                pltpu.VMEM((T * Bp, H), jnp.float32),       # layer-1 outputs (masked)
            ],
        ),
        compiler_params=pltpu.CompilerParams(
            dimension_semantics=("arbitrary",)),
    )(x_flat, lengths_p, wih0_t, whh0_t, b0, w1cat_t, b1, wfc_t, bfc)

    # un-pad + batch-first flatten (tiny: ~32 KB, fuses in XLA)
    logits = logits_tm.reshape(T, Bp, Cp)[:, :B, :C]                # (T, B, C)
    logits_flatten = jnp.transpose(logits, (1, 0, 2)).reshape(B * T, C)
    h_n = h_n_p[:, :B, :]
    c_n = c_n_p[:, :B, :]
    return logits_flatten, (h_n, c_n)


def init_params(key, input_size, hidden_size, num_classes, num_conditions):
    H = hidden_size
    keys = jax.random.split(key, 12)
    u = lambda k, shape, s: jax.random.uniform(k, shape, jnp.float32, -s, s)
    s = 1.0 / jnp.sqrt(H)
    return {
        "char_emb": jax.random.normal(keys[0], (input_size, H), jnp.float32),
        "cond_emb": jax.random.normal(keys[1], (num_conditions, H), jnp.float32),
        "w_ih_l0": u(keys[2], (4 * H, 2 * H), s),
        "w_hh_l0": u(keys[3], (4 * H, H), s),
        "b_ih_l0": u(keys[4], (4 * H,), s),
        "b_hh_l0": u(keys[5], (4 * H,), s),
        "w_ih_l1": u(keys[6], (4 * H, H), s),
        "w_hh_l1": u(keys[7], (4 * H, H), s),
        "b_ih_l1": u(keys[8], (4 * H,), s),
        "b_hh_l1": u(keys[9], (4 * H,), s),
        "w_fc": u(keys[10], (num_classes, H), s),
        "b_fc": u(keys[11], (num_classes,), s),
    }


def _reference_forward(params, seqs, conds, lengths):
    """Pure-JAX reference reproducing the torch module's forward (for validation)."""
    T, B = seqs.shape
    H = params["char_emb"].shape[1]
    C = params["w_fc"].shape[0]
    x = jnp.concatenate([params["char_emb"][seqs],
                         params["cond_emb"][conds]], axis=2).astype(jnp.float32)

    def cell(x_in, h, c, wih, whh, bih, bhh):
        g = x_in @ wih.T + h @ whh.T + bih + bhh
        i, f, gg, o = jnp.split(g, 4, axis=-1)
        c_new = jax.nn.sigmoid(f) * c + jax.nn.sigmoid(i) * jnp.tanh(gg)
        h_new = jax.nn.sigmoid(o) * jnp.tanh(c_new)
        return h_new, c_new

    def step(carry, inp):
        h0, c0, h1, c1 = carry
        x_t, t = inp
        m = (t < lengths)[:, None]
        h0n, c0n = cell(x_t, h0, c0, params["w_ih_l0"], params["w_hh_l0"],
                        params["b_ih_l0"], params["b_hh_l0"])
        h1n, c1n = cell(h0n, h1, c1, params["w_ih_l1"], params["w_hh_l1"],
                        params["b_ih_l1"], params["b_hh_l1"])
        h0 = jnp.where(m, h0n, h0); c0 = jnp.where(m, c0n, c0)
        h1u = jnp.where(m, h1n, h1); c1 = jnp.where(m, c1n, c1)
        out = jnp.where(m, h1n, 0.0)
        return (h0, c0, h1u, c1), out

    init = tuple(jnp.zeros((B, H), jnp.float32) for _ in range(4))
    (h0, c0, h1, c1), outs = lax.scan(step, init, (x, jnp.arange(T)))
    logits = outs @ params["w_fc"].T + params["b_fc"]               # (T, B, C)
    logits_flatten = jnp.transpose(logits, (1, 0, 2)).reshape(-1, C)
    return logits_flatten, (jnp.stack([h0, h1]), jnp.stack([c0, c1]))


if __name__ == "__main__":
    input_size = 40        # character vocab
    hidden_size = 32
    num_classes = 40
    num_conditions = 6
    T, B = 8, 4

    key = jax.random.PRNGKey(0)
    kp, k1, k2 = jax.random.split(key, 3)
    params = init_params(kp, input_size, hidden_size, num_classes, num_conditions)

    input_sequences = jax.random.randint(k1, (T, B), 0, input_size, dtype=jnp.int32)
    input_sequences_conditions = jax.random.randint(k2, (T, B), 0, num_conditions, dtype=jnp.int32)
    # lengths sorted descending (pack_padded_sequence requirement), max == T
    input_sequences_lengths = jnp.array([8, 7, 5, 3], dtype=jnp.int32)

    logits_flatten, (h_n, c_n) = rnn_forward(
        params, input_sequences, input_sequences_conditions, input_sequences_lengths)
    jax.block_until_ready((logits_flatten, h_n, c_n))

    assert logits_flatten.shape == (B * T, num_classes)
    assert h_n.shape == (2, B, hidden_size) and c_n.shape == (2, B, hidden_size)

    # validate against the pure-JAX reference
    ref_logits, (ref_h, ref_c) = _reference_forward(
        params, input_sequences, input_sequences_conditions, input_sequences_lengths)
    assert jnp.allclose(logits_flatten, ref_logits, atol=1e-3, rtol=1e-3)
    assert jnp.allclose(h_n, ref_h, atol=1e-3, rtol=1e-3)
    assert jnp.allclose(c_n, ref_c, atol=1e-3, rtol=1e-3)

    print("KERNEL_OK")
</pallas_src>

<mosaic_0001>
module attributes {stable_mosaic.version = 11 : i64} {
  func.func @_lstm_kernel(%arg0: i32, %arg1: memref<64x64xf32, #tpu.memory_space<vmem>>, %arg2: memref<8x1xi32, #tpu.memory_space<vmem>>, %arg3: memref<64x128xf32, #tpu.memory_space<vmem>>, %arg4: memref<32x128xf32, #tpu.memory_space<vmem>>, %arg5: memref<1x128xf32, #tpu.memory_space<vmem>>, %arg6: memref<64x128xf32, #tpu.memory_space<vmem>>, %arg7: memref<1x128xf32, #tpu.memory_space<vmem>>, %arg8: memref<32x128xf32, #tpu.memory_space<vmem>>, %arg9: memref<1x128xf32, #tpu.memory_space<vmem>>, %arg10: memref<64x128xf32, #tpu.memory_space<vmem>>, %arg11: memref<2x8x32xf32, #tpu.memory_space<vmem>>, %arg12: memref<2x8x32xf32, #tpu.memory_space<vmem>>, %arg13: memref<64x128xf32, #tpu.memory_space<vmem>>, %arg14: memref<64x32xf32, #tpu.memory_space<vmem>>) attributes {dimension_semantics = [#tpu.dimension_semantics<arbitrary>], iteration_bounds = array<i64: 1>, scalar_prefetch = 0 : i64, scratch_operands = 2 : i64, tpu.core_type = #tpu.core_type<tc>, window_params = [{pipeline_mode = #tpu.pipeline_mode<synchronous>, transform_indices = @transform_0, window_bounds = array<i64: 64, 64>}, {pipeline_mode = #tpu.pipeline_mode<synchronous>, transform_indices = @transform_1, window_bounds = array<i64: 8, 1>}, {pipeline_mode = #tpu.pipeline_mode<synchronous>, transform_indices = @transform_2, window_bounds = array<i64: 64, 128>}, {pipeline_mode = #tpu.pipeline_mode<synchronous>, transform_indices = @transform_3, window_bounds = array<i64: 32, 128>}, {pipeline_mode = #tpu.pipeline_mode<synchronous>, transform_indices = @transform_4, window_bounds = array<i64: 1, 128>}, {pipeline_mode = #tpu.pipeline_mode<synchronous>, transform_indices = @transform_5, window_bounds = array<i64: 64, 128>}, {pipeline_mode = #tpu.pipeline_mode<synchronous>, transform_indices = @transform_6, window_bounds = array<i64: 1, 128>}, {pipeline_mode = #tpu.pipeline_mode<synchronous>, transform_indices = @transform_7, window_bounds = array<i64: 32, 128>}, {pipeline_mode = #tpu.pipeline_mode<synchronous>, transform_indices = @transform_8, window_bounds = array<i64: 1, 128>}, {pipeline_mode = #tpu.pipeline_mode<synchronous>, transform_indices = @transform_9, window_bounds = array<i64: 64, 128>}, {pipeline_mode = #tpu.pipeline_mode<synchronous>, transform_indices = @transform_10, window_bounds = array<i64: 2, 8, 32>}, {pipeline_mode = #tpu.pipeline_mode<synchronous>, transform_indices = @transform_11, window_bounds = array<i64: 2, 8, 32>}]} {
    %c0 = arith.constant 0 : index
    %c0_0 = arith.constant 0 : index
    %0 = vector.load %arg1[%c0, %c0_0] : memref<64x64xf32, #tpu.memory_space<vmem>>, vector<64x64xf32>
    %c0_1 = arith.constant 0 : index
    %c0_2 = arith.constant 0 : index
    %1 = vector.load %arg3[%c0_1, %c0_2] : memref<64x128xf32, #tpu.memory_space<vmem>>, vector<64x128xf32>
    %cst = arith.constant dense<0.000000e+00> : vector<64x128xf32>
    %2 = tpu.matmul %0, %1, %cst {dimension_numbers = #tpu.dot_dimension_numbers<[1], [0], [0], [1], [0, 0, 1, 1], [], []>} : vector<64x64xf32>, vector<64x128xf32>, vector<64x128xf32> -> vector<64x128xf32>
    %c0_3 = arith.constant 0 : index
    %c0_4 = arith.constant 0 : index
    %3 = vector.load %arg5[%c0_3, %c0_4] : memref<1x128xf32, #tpu.memory_space<vmem>>, vector<1x128xf32>
    %4 = vector.broadcast %3 : vector<1x128xf32> to vector<64x128xf32>
    %5 = arith.addf %2, %4 : vector<64x128xf32>
    %c0_5 = arith.constant 0 : index
    %c0_6 = arith.constant 0 : index
    %6 = vector.load %arg13[%c0_5, %c0_6] : memref<64x128xf32, #tpu.memory_space<vmem>>, vector<64x128xf32>
    tpu.vector_store %arg13[%c0_5, %c0_6], %5 {strides = array<i32>} : memref<64x128xf32, #tpu.memory_space<vmem>>, vector<64x128xf32>,
    %c0_7 = arith.constant 0 : index
    %c0_8 = arith.constant 0 : index
    %7 = vector.load %arg2[%c0_7, %c0_8] : memref<8x1xi32, #tpu.memory_space<vmem>>, vector<8x1xi32>
    %c0_9 = arith.constant 0 : index
    %c0_10 = arith.constant 0 : index
    %8 = vector.load %arg4[%c0_9, %c0_10] : memref<32x128xf32, #tpu.memory_space<vmem>>, vector<32x128xf32>
    %c0_11 = arith.constant 0 : index
    %c0_12 = arith.constant 0 : index
    %9 = vector.load %arg6[%c0_11, %c0_12] : memref<64x128xf32, #tpu.memory_space<vmem>>, vector<64x128xf32>
    %c0_13 = arith.constant 0 : index
    %c0_14 = arith.constant 0 : index
    %10 = vector.load %arg7[%c0_13, %c0_14] : memref<1x128xf32, #tpu.memory_space<vmem>>, vector<1x128xf32>
    %cst_15 = arith.constant 0.000000e+00 : f32
    %11 = vector.broadcast %cst_15 : f32 to vector<8x128xf32>
    %c0_i32 = arith.constant 0 : i32
    %12 = vector.extract_strided_slice %11 {offsets = [0, 0], sizes = [8, 32], strides = [1, 1]} : vector<8x128xf32> to vector<8x32xf32>
    %13 = vector.extract_strided_slice %11 {offsets = [0, 32], sizes = [8, 32], strides = [1, 1]} : vector<8x128xf32> to vector<8x32xf32>
    %14 = vector.extract_strided_slice %11 {offsets = [0, 64], sizes = [8, 32], strides = [1, 1]} : vector<8x128xf32> to vector<8x32xf32>
    %15 = vector.extract_strided_slice %11 {offsets = [0, 96], sizes = [8, 32], strides = [1, 1]} : vector<8x128xf32> to vector<8x32xf32>
    %16 = vector.broadcast %c0_i32 : i32 to vector<8x1xi32>
    %17 = arith.cmpi slt, %16, %7 : vector<8x1xi32>
    %c8_i32 = arith.constant 8 : i32
    %18 = arith.muli %c0_i32, %c8_i32 : i32
    %19 = tpu.assume_multiple %18, 8 : i32
    %20 = arith.index_cast %19 : i32 to index
    %c0_16 = arith.constant 0 : index
    %21 = vector.load %arg13[%20, %c0_16] : memref<64x128xf32, #tpu.memory_space<vmem>>, vector<8x128xf32>
    %cst_17 = arith.constant dense<0.000000e+00> : vector<8x128xf32>
    %22 = tpu.matmul %12, %8, %cst_17 {dimension_numbers = #tpu.dot_dimension_numbers<[1], [0], [0], [1], [0, 0, 1, 1], [], []>} : vector<8x32xf32>, vector<32x128xf32>, vector<8x128xf32> -> vector<8x128xf32>
    %23 = arith.addf %21, %22 : vector<8x128xf32>
    %24 = vector.extract_strided_slice %23 {offsets = [0, 0], sizes = [8, 32], strides = [1, 1]} : vector<8x128xf32> to vector<8x32xf32>
    %25 = arith.negf %24 : vector<8x32xf32>
    %26 = math.exp %25 : vector<8x32xf32>
    %cst_18 = arith.constant 1.000000e+00 : f32
    %27 = vector.broadcast %cst_18 : f32 to vector<8x32xf32>
    %28 = arith.addf %27, %26 : vector<8x32xf32>
    %29 = arith.divf %27, %28 : vector<8x32xf32>
    %30 = vector.extract_strided_slice %23 {offsets = [0, 32], sizes = [8, 32], strides = [1, 1]} : vector<8x128xf32> to vector<8x32xf32>
    %31 = arith.negf %30 : vector<8x32xf32>
    %32 = math.exp %31 : vector<8x32xf32>
    %cst_19 = arith.constant 1.000000e+00 : f32
    %33 = vector.broadcast %cst_19 : f32 to vector<8x32xf32>
    %34 = arith.addf %33, %32 : vector<8x32xf32>
    %35 = arith.divf %33, %34 : vector<8x32xf32>
    %36 = vector.extract_strided_slice %23 {offsets = [0, 64], sizes = [8, 32], strides = [1, 1]} : vector<8x128xf32> to vector<8x32xf32>
    %37 = math.tanh %36 : vector<8x32xf32>
    %38 = vector.extract_strided_slice %23 {offsets = [0, 96], sizes = [8, 32], strides = [1, 1]} : vector<8x128xf32> to vector<8x32xf32>
    %39 = arith.negf %38 : vector<8x32xf32>
    %40 = math.exp %39 : vector<8x32xf32>
    %cst_20 = arith.constant 1.000000e+00 : f32
    %41 = vector.broadcast %cst_20 : f32 to vector<8x32xf32>
    %42 = arith.addf %41, %40 : vector<8x32xf32>
    %43 = arith.divf %41, %42 : vector<8x32xf32>
    %44 = arith.mulf %35, %13 : vector<8x32xf32>
    %45 = arith.mulf %29, %37 : vector<8x32xf32>
    %46 = arith.addf %44, %45 : vector<8x32xf32>
    %47 = math.tanh %46 : vector<8x32xf32>
    %48 = arith.mulf %43, %47 : vector<8x32xf32>
    %49 = tpu.concatenate %48, %14 in 1 : vector<8x32xf32>, vector<8x32xf32> -> vector<8x64xf32>
    %cst_21 = arith.constant dense<0.000000e+00> : vector<8x128xf32>
    %50 = tpu.matmul %49, %9, %cst_21 {dimension_numbers = #tpu.dot_dimension_numbers<[1], [0], [0], [1], [0, 0, 1, 1], [], []>} : vector<8x64xf32>, vector<64x128xf32>, vector<8x128xf32> -> vector<8x128xf32>
    %51 = vector.broadcast %10 : vector<1x128xf32> to vector<8x128xf32>
    %52 = arith.addf %50, %51 : vector<8x128xf32>
    %53 = vector.extract_strided_slice %52 {offsets = [0, 0], sizes = [8, 32], strides = [1, 1]} : vector<8x128xf32> to vector<8x32xf32>
    %54 = arith.negf %53 : vector<8x32xf32>
    %55 = math.exp %54 : vector<8x32xf32>
    %cst_22 = arith.constant 1.000000e+00 : f32
    %56 = vector.broadcast %cst_22 : f32 to vector<8x32xf32>
    %57 = arith.addf %56, %55 : vector<8x32xf32>
    %58 = arith.divf %56, %57 : vector<8x32xf32>
    %59 = vector.extract_strided_slice %52 {offsets = [0, 32], sizes = [8, 32], strides = [1, 1]} : vector<8x128xf32> to vector<8x32xf32>
    %60 = arith.negf %59 : vector<8x32xf32>
    %61 = math.exp %60 : vector<8x32xf32>
    %cst_23 = arith.constant 1.000000e+00 : f32
    %62 = vector.broadcast %cst_23 : f32 to vector<8x32xf32>
    %63 = arith.addf %62, %61 : vector<8x32xf32>
    %64 = arith.divf %62, %63 : vector<8x32xf32>
    %65 = vector.extract_strided_slice %52 {offsets = [0, 64], sizes = [8, 32], strides = [1, 1]} : vector<8x128xf32> to vector<8x32xf32>
    %66 = math.tanh %65 : vector<8x32xf32>
    %67 = vector.extract_strided_slice %52 {offsets = [0, 96], sizes = [8, 32], strides = [1, 1]} : vector<8x128xf32> to vector<8x32xf32>
    %68 = arith.negf %67 : vector<8x32xf32>
    %69 = math.exp %68 : vector<8x32xf32>
    %cst_24 = arith.constant 1.000000e+00 : f32
    %70 = vector.broadcast %cst_24 : f32 to vector<8x32xf32>
    %71 = arith.addf %70, %69 : vector<8x32xf32>
    %72 = arith.divf %70, %71 : vector<8x32xf32>
    %73 = arith.mulf %64, %15 : vector<8x32xf32>
    %74 = arith.mulf %58, %66 : vector<8x32xf32>
    %75 = arith.addf %73, %74 : vector<8x32xf32>
    %76 = math.tanh %75 : vector<8x32xf32>
    %77 = arith.mulf %72, %76 : vector<8x32xf32>
    %78 = tpu.concatenate %48, %46, %77, %75 in 1 : vector<8x32xf32>, vector<8x32xf32>, vector<8x32xf32>, vector<8x32xf32> -> vector<8x128xf32>
    %79 = vector.shape_cast %17 : vector<8x1xi1> to vector<8x1xi1>
    %80 = vector.broadcast %79 : vector<8x1xi1> to vector<8x128xi1>
    %81 = arith.select %80, %78, %11 : vector<8x128xi1>, vector<8x128xf32>
    %cst_25 = arith.constant 0.000000e+00 : f32
    %82 = vector.broadcast %cst_25 : f32 to vector<8x32xf32>
    %83 = vector.shape_cast %17 : vector<8x1xi1> to vector<8x1xi1>
    %84 = vector.broadcast %83 : vector<8x1xi1> to vector<8x32xi1>
    %85 = arith.select %84, %77, %82 : vector<8x32xi1>, vector<8x32xf32>
    %86 = arith.index_cast %19 : i32 to index
    %c0_26 = arith.constant 0 : index
    %87 = vector.load %arg14[%86, %c0_26] : memref<64x32xf32, #tpu.memory_space<vmem>>, vector<8x32xf32>
    tpu.vector_store %arg14[%86, %c0_26], %85 {strides = array<i32>} : memref<64x32xf32, #tpu.memory_space<vmem>>, vector<8x32xf32>,
    %c1_i32 = arith.constant 1 : i32
    %88 = vector.extract_strided_slice %81 {offsets = [0, 0], sizes = [8, 32], strides = [1, 1]} : vector<8x128xf32> to vector<8x32xf32>
    %89 = vector.extract_strided_slice %81 {offsets = [0, 32], sizes = [8, 32], strides = [1, 1]} : vector<8x128xf32> to vector<8x32xf32>
    %90 = vector.extract_strided_slice %81 {offsets = [0, 64], sizes = [8, 32], strides = [1, 1]} : vector<8x128xf32> to vector<8x32xf32>
    %91 = vector.extract_strided_slice %81 {offsets = [0, 96], sizes = [8, 32], strides = [1, 1]} : vector<8x128xf32> to vector<8x32xf32>
    %92 = vector.broadcast %c1_i32 : i32 to vector<8x1xi32>
    %93 = arith.cmpi slt, %92, %7 : vector<8x1xi32>
    %c8_i32_27 = arith.constant 8 : i32
    %94 = arith.muli %c1_i32, %c8_i32_27 : i32
    %95 = tpu.assume_multiple %94, 8 : i32
    %96 = arith.index_cast %95 : i32 to index
    %c0_28 = arith.constant 0 : index
    %97 = vector.load %arg13[%96, %c0_28] : memref<64x128xf32, #tpu.memory_space<vmem>>, vector<8x128xf32>
    %cst_29 = arith.constant dense<0.000000e+00> : vector<8x128xf32>
    %98 = tpu.matmul %88, %8, %cst_29 {dimension_numbers = #tpu.dot_dimension_numbers<[1], [0], [0], [1], [0, 0, 1, 1], [], []>} : vector<8x32xf32>, vector<32x128xf32>, vector<8x128xf32> -> vector<8x128xf32>
    %99 = arith.addf %97, %98 : vector<8x128xf32>
    %100 = vector.extract_strided_slice %99 {offsets = [0, 0], sizes = [8, 32], strides = [1, 1]} : vector<8x128xf32> to vector<8x32xf32>
    %101 = arith.negf %100 : vector<8x32xf32>
    %102 = math.exp %101 : vector<8x32xf32>
    %cst_30 = arith.constant 1.000000e+00 : f32
    %103 = vector.broadcast %cst_30 : f32 to vector<8x32xf32>
    %104 = arith.addf %103, %102 : vector<8x32xf32>
    %105 = arith.divf %103, %104 : vector<8x32xf32>
    %106 = vector.extract_strided_slice %99 {offsets = [0, 32], sizes = [8, 32], strides = [1, 1]} : vector<8x128xf32> to vector<8x32xf32>
    %107 = arith.negf %106 : vector<8x32xf32>
    %108 = math.exp %107 : vector<8x32xf32>
    %cst_31 = arith.constant 1.000000e+00 : f32
    %109 = vector.broadcast %cst_31 : f32 to vector<8x32xf32>
    %110 = arith.addf %109, %108 : vector<8x32xf32>
    %111 = arith.divf %109, %110 : vector<8x32xf32>
    %112 = vector.extract_strided_slice %99 {offsets = [0, 64], sizes = [8, 32], strides = [1, 1]} : vector<8x128xf32> to vector<8x32xf32>
    %113 = math.tanh %112 : vector<8x32xf32>
    %114 = vector.extract_strided_slice %99 {offsets = [0, 96], sizes = [8, 32], strides = [1, 1]} : vector<8x128xf32> to vector<8x32xf32>
    %115 = arith.negf %114 : vector<8x32xf32>
    %116 = math.exp %115 : vector<8x32xf32>
    %cst_32 = arith.constant 1.000000e+00 : f32
    %117 = vector.broadcast %cst_32 : f32 to vector<8x32xf32>
    %118 = arith.addf %117, %116 : vector<8x32xf32>
    %119 = arith.divf %117, %118 : vector<8x32xf32>
    %120 = arith.mulf %111, %89 : vector<8x32xf32>
    %121 = arith.mulf %105, %113 : vector<8x32xf32>
    %122 = arith.addf %120, %121 : vector<8x32xf32>
    %123 = math.tanh %122 : vector<8x32xf32>
    %124 = arith.mulf %119, %123 : vector<8x32xf32>
    %125 = tpu.concatenate %124, %90 in 1 : vector<8x32xf32>, vector<8x32xf32> -> vector<8x64xf32>
    %cst_33 = arith.constant dense<0.000000e+00> : vector<8x128xf32>
    %126 = tpu.matmul %125, %9, %cst_33 {dimension_numbers = #tpu.dot_dimension_numbers<[1], [0], [0], [1], [0, 0, 1, 1], [], []>} : vector<8x64xf32>, vector<64x128xf32>, vector<8x128xf32> -> vector<8x128xf32>
    %127 = vector.broadcast %10 : vector<1x128xf32> to vector<8x128xf32>
    %128 = arith.addf %126, %127 : vector<8x128xf32>
    %129 = vector.extract_strided_slice %128 {offsets = [0, 0], sizes = [8, 32], strides = [1, 1]} : vector<8x128xf32> to vector<8x32xf32>
    %130 = arith.negf %129 : vector<8x32xf32>
    %131 = math.exp %130 : vector<8x32xf32>
    %cst_34 = arith.constant 1.000000e+00 : f32
    %132 = vector.broadcast %cst_34 : f32 to vector<8x32xf32>
    %133 = arith.addf %132, %131 : vector<8x32xf32>
    %134 = arith.divf %132, %133 : vector<8x32xf32>
    %135 = vector.extract_strided_slice %128 {offsets = [0, 32], sizes = [8, 32], strides = [1, 1]} : vector<8x128xf32> to vector<8x32xf32>
    %136 = arith.negf %135 : vector<8x32xf32>
    %137 = math.exp %136 : vector<8x32xf32>
    %cst_35 = arith.constant 1.000000e+00 : f32
    %138 = vector.broadcast %cst_35 : f32 to vector<8x32xf32>
    %139 = arith.addf %138, %137 : vector<8x32xf32>
    %140 = arith.divf %138, %139 : vector<8x32xf32>
    %141 = vector.extract_strided_slice %128 {offsets = [0, 64], sizes = [8, 32], strides = [1, 1]} : vector<8x128xf32> to vector<8x32xf32>
    %142 = math.tanh %141 : vector<8x32xf32>
    %143 = vector.extract_strided_slice %128 {offsets = [0, 96], sizes = [8, 32], strides = [1, 1]} : vector<8x128xf32> to vector<8x32xf32>
    %144 = arith.negf %143 : vector<8x32xf32>
    %145 = math.exp %144 : vector<8x32xf32>
    %cst_36 = arith.constant 1.000000e+00 : f32
    %146 = vector.broadcast %cst_36 : f32 to vector<8x32xf32>
    %147 = arith.addf %146, %145 : vector<8x32xf32>
    %148 = arith.divf %146, %147 : vector<8x32xf32>
    %149 = arith.mulf %140, %91 : vector<8x32xf32>
    %150 = arith.mulf %134, %142 : vector<8x32xf32>
    %151 = arith.addf %149, %150 : vector<8x32xf32>
    %152 = math.tanh %151 : vector<8x32xf32>
    %153 = arith.mulf %148, %152 : vector<8x32xf32>
    %154 = tpu.concatenate %124, %122, %153, %151 in 1 : vector<8x32xf32>, vector<8x32xf32>, vector<8x32xf32>, vector<8x32xf32> -> vector<8x128xf32>
    %155 = vector.shape_cast %93 : vector<8x1xi1> to vector<8x1xi1>
    %156 = vector.broadcast %155 : vector<8x1xi1> to vector<8x128xi1>
    %157 = arith.select %156, %154, %81 : vector<8x128xi1>, vector<8x128xf32>
    %cst_37 = arith.constant 0.000000e+00 : f32
    %158 = vector.broadcast %cst_37 : f32 to vector<8x32xf32>
    %159 = vector.shape_cast %93 : vector<8x1xi1> to vector<8x1xi1>
    %160 = vector.broadcast %159 : vector<8x1xi1> to vector<8x32xi1>
    %161 = arith.select %160, %153, %158 : vector<8x32xi1>, vector<8x32xf32>
    %162 = arith.index_cast %95 : i32 to index
    %c0_38 = arith.constant 0 : index
    %163 = vector.load %arg14[%162, %c0_38] : memref<64x32xf32, #tpu.memory_space<vmem>>, vector<8x32xf32>
    tpu.vector_store %arg14[%162, %c0_38], %161 {strides = array<i32>} : memref<64x32xf32, #tpu.memory_space<vmem>>, vector<8x32xf32>,
    %c2_i32 = arith.constant 2 : i32
    %164 = vector.extract_strided_slice %157 {offsets = [0, 0], sizes = [8, 32], strides = [1, 1]} : vector<8x128xf32> to vector<8x32xf32>
    %165 = vector.extract_strided_slice %157 {offsets = [0, 32], sizes = [8, 32], strides = [1, 1]} : vector<8x128xf32> to vector<8x32xf32>
    %166 = vector.extract_strided_slice %157 {offsets = [0, 64], sizes = [8, 32], strides = [1, 1]} : vector<8x128xf32> to vector<8x32xf32>
    %167 = vector.extract_strided_slice %157 {offsets = [0, 96], sizes = [8, 32], strides = [1, 1]} : vector<8x128xf32> to vector<8x32xf32>
    %168 = vector.broadcast %c2_i32 : i32 to vector<8x1xi32>
    %169 = arith.cmpi slt, %168, %7 : vector<8x1xi32>
    %c8_i32_39 = arith.constant 8 : i32
    %170 = arith.muli %c2_i32, %c8_i32_39 : i32
    %171 = tpu.assume_multiple %170, 8 : i32
    %172 = arith.index_cast %171 : i32 to index
    %c0_40 = arith.constant 0 : index
    %173 = vector.load %arg13[%172, %c0_40] : memref<64x128xf32, #tpu.memory_space<vmem>>, vector<8x128xf32>
    %cst_41 = arith.constant dense<0.000000e+00> : vector<8x128xf32>
    %174 = tpu.matmul %164, %8, %cst_41 {dimension_numbers = #tpu.dot_dimension_numbers<[1], [0], [0], [1], [0, 0, 1, 1], [], []>} : vector<8x32xf32>, vector<32x128xf32>, vector<8x128xf32> -> vector<8x128xf32>
    %175 = arith.addf %173, %174 : vector<8x128xf32>
    %176 = vector.extract_strided_slice %175 {offsets = [0, 0], sizes = [8, 32], strides = [1, 1]} : vector<8x128xf32> to vector<8x32xf32>
    %177 = arith.negf %176 : vector<8x32xf32>
    %178 = math.exp %177 : vector<8x32xf32>
    %cst_42 = arith.constant 1.000000e+00 : f32
    %179 = vector.broadcast %cst_42 : f32 to vector<8x32xf32>
    %180 = arith.addf %179, %178 : vector<8x32xf32>
    %181 = arith.divf %179, %180 : vector<8x32xf32>
    %182 = vector.extract_strided_slice %175 {offsets = [0, 32], sizes = [8, 32], strides = [1, 1]} : vector<8x128xf32> to vector<8x32xf32>
    %183 = arith.negf %182 : vector<8x32xf32>
    %184 = math.exp %183 : vector<8x32xf32>
    %cst_43 = arith.constant 1.000000e+00 : f32
    %185 = vector.broadcast %cst_43 : f32 to vector<8x32xf32>
    %186 = arith.addf %185, %184 : vector<8x32xf32>
    %187 = arith.divf %185, %186 : vector<8x32xf32>
    %188 = vector.extract_strided_slice %175 {offsets = [0, 64], sizes = [8, 32], strides = [1, 1]} : vector<8x128xf32> to vector<8x32xf32>
    %189 = math.tanh %188 : vector<8x32xf32>
    %190 = vector.extract_strided_slice %175 {offsets = [0, 96], sizes = [8, 32], strides = [1, 1]} : vector<8x128xf32> to vector<8x32xf32>
    %191 = arith.negf %190 : vector<8x32xf32>
    %192 = math.exp %191 : vector<8x32xf32>
    %cst_44 = arith.constant 1.000000e+00 : f32
    %193 = vector.broadcast %cst_44 : f32 to vector<8x32xf32>
    %194 = arith.addf %193, %192 : vector<8x32xf32>
    %195 = arith.divf %193, %194 : vector<8x32xf32>
    %196 = arith.mulf %187, %165 : vector<8x32xf32>
    %197 = arith.mulf %181, %189 : vector<8x32xf32>
    %198 = arith.addf %196, %197 : vector<8x32xf32>
    %199 = math.tanh %198 : vector<8x32xf32>
    %200 = arith.mulf %195, %199 : vector<8x32xf32>
    %201 = tpu.concatenate %200, %166 in 1 : vector<8x32xf32>, vector<8x32xf32> -> vector<8x64xf32>
    %cst_45 = arith.constant dense<0.000000e+00> : vector<8x128xf32>
    %202 = tpu.matmul %201, %9, %cst_45 {dimension_numbers = #tpu.dot_dimension_numbers<[1], [0], [0], [1], [0, 0, 1, 1], [], []>} : vector<8x64xf32>, vector<64x128xf32>, vector<8x128xf32> -> vector<8x128xf32>
    %203 = vector.broadcast %10 : vector<1x128xf32> to vector<8x128xf32>
    %204 = arith.addf %202, %203 : vector<8x128xf32>
    %205 = vector.extract_strided_slice %204 {offsets = [0, 0], sizes = [8, 32], strides = [1, 1]} : vector<8x128xf32> to vector<8x32xf32>
    %206 = arith.negf %205 : vector<8x32xf32>
    %207 = math.exp %206 : vector<8x32xf32>
    %cst_46 = arith.constant 1.000000e+00 : f32
    %208 = vector.broadcast %cst_46 : f32 to vector<8x32xf32>
    %209 = arith.addf %208, %207 : vector<8x32xf32>
    %210 = arith.divf %208, %209 : vector<8x32xf32>
    %211 = vector.extract_strided_slice %204 {offsets = [0, 32], sizes = [8, 32], strides = [1, 1]} : vector<8x128xf32> to vector<8x32xf32>
    %212 = arith.negf %211 : vector<8x32xf32>
    %213 = math.exp %212 : vector<8x32xf32>
    %cst_47 = arith.constant 1.000000e+00 : f32
    %214 = vector.broadcast %cst_47 : f32 to vector<8x32xf32>
    %215 = arith.addf %214, %213 : vector<8x32xf32>
    %216 = arith.divf %214, %215 : vector<8x32xf32>
    %217 = vector.extract_strided_slice %204 {offsets = [0, 64], sizes = [8, 32], strides = [1, 1]} : vector<8x128xf32> to vector<8x32xf32>
    %218 = math.tanh %217 : vector<8x32xf32>
    %219 = vector.extract_strided_slice %204 {offsets = [0, 96], sizes = [8, 32], strides = [1, 1]} : vector<8x128xf32> to vector<8x32xf32>
    %220 = arith.negf %219 : vector<8x32xf32>
    %221 = math.exp %220 : vector<8x32xf32>
    %cst_48 = arith.constant 1.000000e+00 : f32
    %222 = vector.broadcast %cst_48 : f32 to vector<8x32xf32>
    %223 = arith.addf %222, %221 : vector<8x32xf32>
    %224 = arith.divf %222, %223 : vector<8x32xf32>
    %225 = arith.mulf %216, %167 : vector<8x32xf32>
    %226 = arith.mulf %210, %218 : vector<8x32xf32>
    %227 = arith.addf %225, %226 : vector<8x32xf32>
    %228 = math.tanh %227 : vector<8x32xf32>
    %229 = arith.mulf %224, %228 : vector<8x32xf32>
    %230 = tpu.concatenate %200, %198, %229, %227 in 1 : vector<8x32xf32>, vector<8x32xf32>, vector<8x32xf32>, vector<8x32xf32> -> vector<8x128xf32>
    %231 = vector.shape_cast %169 : vector<8x1xi1> to vector<8x1xi1>
    %232 = vector.broadcast %231 : vector<8x1xi1> to vector<8x128xi1>
    %233 = arith.select %232, %230, %157 : vector<8x128xi1>, vector<8x128xf32>
    %cst_49 = arith.constant 0.000000e+00 : f32
    %234 = vector.broadcast %cst_49 : f32 to vector<8x32xf32>
    %235 = vector.shape_cast %169 : vector<8x1xi1> to vector<8x1xi1>
    %236 = vector.broadcast %235 : vector<8x1xi1> to vector<8x32xi1>
    %237 = arith.select %236, %229, %234 : vector<8x32xi1>, vector<8x32xf32>
    %238 = arith.index_cast %171 : i32 to index
    %c0_50 = arith.constant 0 : index
    %239 = vector.load %arg14[%238, %c0_50] : memref<64x32xf32, #tpu.memory_space<vmem>>, vector<8x32xf32>
    tpu.vector_store %arg14[%238, %c0_50], %237 {strides = array<i32>} : memref<64x32xf32, #tpu.memory_space<vmem>>, vector<8x32xf32>,
    %c3_i32 = arith.constant 3 : i32
    %240 = vector.extract_strided_slice %233 {offsets = [0, 0], sizes = [8, 32], strides = [1, 1]} : vector<8x128xf32> to vector<8x32xf32>
    %241 = vector.extract_strided_slice %233 {offsets = [0, 32], sizes = [8, 32], strides = [1, 1]} : vector<8x128xf32> to vector<8x32xf32>
    %242 = vector.extract_strided_slice %233 {offsets = [0, 64], sizes = [8, 32], strides = [1, 1]} : vector<8x128xf32> to vector<8x32xf32>
    %243 = vector.extract_strided_slice %233 {offsets = [0, 96], sizes = [8, 32], strides = [1, 1]} : vector<8x128xf32> to vector<8x32xf32>
    %244 = vector.broadcast %c3_i32 : i32 to vector<8x1xi32>
    %245 = arith.cmpi slt, %244, %7 : vector<8x1xi32>
    %c8_i32_51 = arith.constant 8 : i32
    %246 = arith.muli %c3_i32, %c8_i32_51 : i32
    %247 = tpu.assume_multiple %246, 8 : i32
    %248 = arith.index_cast %247 : i32 to index
    %c0_52 = arith.constant 0 : index
    %249 = vector.load %arg13[%248, %c0_52] : memref<64x128xf32, #tpu.memory_space<vmem>>, vector<8x128xf32>
    %cst_53 = arith.constant dense<0.000000e+00> : vector<8x128xf32>
    %250 = tpu.matmul %240, %8, %cst_53 {dimension_numbers = #tpu.dot_dimension_numbers<[1], [0], [0], [1], [0, 0, 1, 1], [], []>} : vector<8x32xf32>, vector<32x128xf32>, vector<8x128xf32> -> vector<8x128xf32>
    %251 = arith.addf %249, %250 : vector<8x128xf32>
    %252 = vector.extract_strided_slice %251 {offsets = [0, 0], sizes = [8, 32], strides = [1, 1]} : vector<8x128xf32> to vector<8x32xf32>
    %253 = arith.negf %252 : vector<8x32xf32>
    %254 = math.exp %253 : vector<8x32xf32>
    %cst_54 = arith.constant 1.000000e+00 : f32
    %255 = vector.broadcast %cst_54 : f32 to vector<8x32xf32>
    %256 = arith.addf %255, %254 : vector<8x32xf32>
    %257 = arith.divf %255, %256 : vector<8x32xf32>
    %258 = vector.extract_strided_slice %251 {offsets = [0, 32], sizes = [8, 32], strides = [1, 1]} : vector<8x128xf32> to vector<8x32xf32>
    %259 = arith.negf %258 : vector<8x32xf32>
    %260 = math.exp %259 : vector<8x32xf32>
    %cst_55 = arith.constant 1.000000e+00 : f32
    %261 = vector.broadcast %cst_55 : f32 to vector<8x32xf32>
    %262 = arith.addf %261, %260 : vector<8x32xf32>
    %263 = arith.divf %261, %262 : vector<8x32xf32>
    %264 = vector.extract_strided_slice %251 {offsets = [0, 64], sizes = [8, 32], strides = [1, 1]} : vector<8x128xf32> to vector<8x32xf32>
    %265 = math.tanh %264 : vector<8x32xf32>
    %266 = vector.extract_strided_slice %251 {offsets = [0, 96], sizes = [8, 32], strides = [1, 1]} : vector<8x128xf32> to vector<8x32xf32>
    %267 = arith.negf %266 : vector<8x32xf32>
    %268 = math.exp %267 : vector<8x32xf32>
    %cst_56 = arith.constant 1.000000e+00 : f32
    %269 = vector.broadcast %cst_56 : f32 to vector<8x32xf32>
    %270 = arith.addf %269, %268 : vector<8x32xf32>
    %271 = arith.divf %269, %270 : vector<8x32xf32>
    %272 = arith.mulf %263, %241 : vector<8x32xf32>
    %273 = arith.mulf %257, %265 : vector<8x32xf32>
    %274 = arith.addf %272, %273 : vector<8x32xf32>
    %275 = math.tanh %274 : vector<8x32xf32>
    %276 = arith.mulf %271, %275 : vector<8x32xf32>
    %277 = tpu.concatenate %276, %242 in 1 : vector<8x32xf32>, vector<8x32xf32> -> vector<8x64xf32>
    %cst_57 = arith.constant dense<0.000000e+00> : vector<8x128xf32>
    %278 = tpu.matmul %277, %9, %cst_57 {dimension_numbers = #tpu.dot_dimension_numbers<[1], [0], [0], [1], [0, 0, 1, 1], [], []>} : vector<8x64xf32>, vector<64x128xf32>, vector<8x128xf32> -> vector<8x128xf32>
    %279 = vector.broadcast %10 : vector<1x128xf32> to vector<8x128xf32>
    %280 = arith.addf %278, %279 : vector<8x128xf32>
    %281 = vector.extract_strided_slice %280 {offsets = [0, 0], sizes = [8, 32], strides = [1, 1]} : vector<8x128xf32> to vector<8x32xf32>
    %282 = arith.negf %281 : vector<8x32xf32>
    %283 = math.exp %282 : vector<8x32xf32>
    %cst_58 = arith.constant 1.000000e+00 : f32
    %284 = vector.broadcast %cst_58 : f32 to vector<8x32xf32>
    %285 = arith.addf %284, %283 : vector<8x32xf32>
    %286 = arith.divf %284, %285 : vector<8x32xf32>
    %287 = vector.extract_strided_slice %280 {offsets = [0, 32], sizes = [8, 32], strides = [1, 1]} : vector<8x128xf32> to vector<8x32xf32>
    %288 = arith.negf %287 : vector<8x32xf32>
    %289 = math.exp %288 : vector<8x32xf32>
    %cst_59 = arith.constant 1.000000e+00 : f32
    %290 = vector.broadcast %cst_59 : f32 to vector<8x32xf32>
    %291 = arith.addf %290, %289 : vector<8x32xf32>
    %292 = arith.divf %290, %291 : vector<8x32xf32>
    %293 = vector.extract_strided_slice %280 {offsets = [0, 64], sizes = [8, 32], strides = [1, 1]} : vector<8x128xf32> to vector<8x32xf32>
    %294 = math.tanh %293 : vector<8x32xf32>
    %295 = vector.extract_strided_slice %280 {offsets = [0, 96], sizes = [8, 32], strides = [1, 1]} : vector<8x128xf32> to vector<8x32xf32>
    %296 = arith.negf %295 : vector<8x32xf32>
    %297 = math.exp %296 : vector<8x32xf32>
    %cst_60 = arith.constant 1.000000e+00 : f32
    %298 = vector.broadcast %cst_60 : f32 to vector<8x32xf32>
    %299 = arith.addf %298, %297 : vector<8x32xf32>
    %300 = arith.divf %298, %299 : vector<8x32xf32>
    %301 = arith.mulf %292, %243 : vector<8x32xf32>
    %302 = arith.mulf %286, %294 : vector<8x32xf32>
    %303 = arith.addf %301, %302 : vector<8x32xf32>
    %304 = math.tanh %303 : vector<8x32xf32>
    %305 = arith.mulf %300, %304 : vector<8x32xf32>
    %306 = tpu.concatenate %276, %274, %305, %303 in 1 : vector<8x32xf32>, vector<8x32xf32>, vector<8x32xf32>, vector<8x32xf32> -> vector<8x128xf32>
    %307 = vector.shape_cast %245 : vector<8x1xi1> to vector<8x1xi1>
    %308 = vector.broadcast %307 : vector<8x1xi1> to vector<8x128xi1>
    %309 = arith.select %308, %306, %233 : vector<8x128xi1>, vector<8x128xf32>
    %cst_61 = arith.constant 0.000000e+00 : f32
    %310 = vector.broadcast %cst_61 : f32 to vector<8x32xf32>
    %311 = vector.shape_cast %245 : vector<8x1xi1> to vector<8x1xi1>
    %312 = vector.broadcast %311 : vector<8x1xi1> to vector<8x32xi1>
    %313 = arith.select %312, %305, %310 : vector<8x32xi1>, vector<8x32xf32>
    %314 = arith.index_cast %247 : i32 to index
    %c0_62 = arith.constant 0 : index
    %315 = vector.load %arg14[%314, %c0_62] : memref<64x32xf32, #tpu.memory_space<vmem>>, vector<8x32xf32>
    tpu.vector_store %arg14[%314, %c0_62], %313 {strides = array<i32>} : memref<64x32xf32, #tpu.memory_space<vmem>>, vector<8x32xf32>,
    %c4_i32 = arith.constant 4 : i32
    %316 = vector.extract_strided_slice %309 {offsets = [0, 0], sizes = [8, 32], strides = [1, 1]} : vector<8x128xf32> to vector<8x32xf32>
    %317 = vector.extract_strided_slice %309 {offsets = [0, 32], sizes = [8, 32], strides = [1, 1]} : vector<8x128xf32> to vector<8x32xf32>
    %318 = vector.extract_strided_slice %309 {offsets = [0, 64], sizes = [8, 32], strides = [1, 1]} : vector<8x128xf32> to vector<8x32xf32>
    %319 = vector.extract_strided_slice %309 {offsets = [0, 96], sizes = [8, 32], strides = [1, 1]} : vector<8x128xf32> to vector<8x32xf32>
    %320 = vector.broadcast %c4_i32 : i32 to vector<8x1xi32>
    %321 = arith.cmpi slt, %320, %7 : vector<8x1xi32>
    %c8_i32_63 = arith.constant 8 : i32
    %322 = arith.muli %c4_i32, %c8_i32_63 : i32
    %323 = tpu.assume_multiple %322, 8 : i32
    %324 = arith.index_cast %323 : i32 to index
    %c0_64 = arith.constant 0 : index
    %325 = vector.load %arg13[%324, %c0_64] : memref<64x128xf32, #tpu.memory_space<vmem>>, vector<8x128xf32>
    %cst_65 = arith.constant dense<0.000000e+00> : vector<8x128xf32>
    %326 = tpu.matmul %316, %8, %cst_65 {dimension_numbers = #tpu.dot_dimension_numbers<[1], [0], [0], [1], [0, 0, 1, 1], [], []>} : vector<8x32xf32>, vector<32x128xf32>, vector<8x128xf32> -> vector<8x128xf32>
    %327 = arith.addf %325, %326 : vector<8x128xf32>
    %328 = vector.extract_strided_slice %327 {offsets = [0, 0], sizes = [8, 32], strides = [1, 1]} : vector<8x128xf32> to vector<8x32xf32>
    %329 = arith.negf %328 : vector<8x32xf32>
    %330 = math.exp %329 : vector<8x32xf32>
    %cst_66 = arith.constant 1.000000e+00 : f32
    %331 = vector.broadcast %cst_66 : f32 to vector<8x32xf32>
    %332 = arith.addf %331, %330 : vector<8x32xf32>
    %333 = arith.divf %331, %332 : vector<8x32xf32>
    %334 = vector.extract_strided_slice %327 {offsets = [0, 32], sizes = [8, 32], strides = [1, 1]} : vector<8x128xf32> to vector<8x32xf32>
    %335 = arith.negf %334 : vector<8x32xf32>
    %336 = math.exp %335 : vector<8x32xf32>
    %cst_67 = arith.constant 1.000000e+00 : f32
    %337 = vector.broadcast %cst_67 : f32 to vector<8x32xf32>
    %338 = arith.addf %337, %336 : vector<8x32xf32>
    %339 = arith.divf %337, %338 : vector<8x32xf32>
    %340 = vector.extract_strided_slice %327 {offsets = [0, 64], sizes = [8, 32], strides = [1, 1]} : vector<8x128xf32> to vector<8x32xf32>
    %341 = math.tanh %340 : vector<8x32xf32>
    %342 = vector.extract_strided_slice %327 {offsets = [0, 96], sizes = [8, 32], strides = [1, 1]} : vector<8x128xf32> to vector<8x32xf32>
    %343 = arith.negf %342 : vector<8x32xf32>
    %344 = math.exp %343 : vector<8x32xf32>
    %cst_68 = arith.constant 1.000000e+00 : f32
    %345 = vector.broadcast %cst_68 : f32 to vector<8x32xf32>
    %346 = arith.addf %345, %344 : vector<8x32xf32>
    %347 = arith.divf %345, %346 : vector<8x32xf32>
    %348 = arith.mulf %339, %317 : vector<8x32xf32>
    %349 = arith.mulf %333, %341 : vector<8x32xf32>
    %350 = arith.addf %348, %349 : vector<8x32xf32>
    %351 = math.tanh %350 : vector<8x32xf32>
    %352 = arith.mulf %347, %351 : vector<8x32xf32>
    %353 = tpu.concatenate %352, %318 in 1 : vector<8x32xf32>, vector<8x32xf32> -> vector<8x64xf32>
    %cst_69 = arith.constant dense<0.000000e+00> : vector<8x128xf32>
    %354 = tpu.matmul %353, %9, %cst_69 {dimension_numbers = #tpu.dot_dimension_numbers<[1], [0], [0], [1], [0, 0, 1, 1], [], []>} : vector<8x64xf32>, vector<64x128xf32>, vector<8x128xf32> -> vector<8x128xf32>
    %355 = vector.broadcast %10 : vector<1x128xf32> to vector<8x128xf32>
    %356 = arith.addf %354, %355 : vector<8x128xf32>
    %357 = vector.extract_strided_slice %356 {offsets = [0, 0], sizes = [8, 32], strides = [1, 1]} : vector<8x128xf32> to vector<8x32xf32>
    %358 = arith.negf %357 : vector<8x32xf32>
    %359 = math.exp %358 : vector<8x32xf32>
    %cst_70 = arith.constant 1.000000e+00 : f32
    %360 = vector.broadcast %cst_70 : f32 to vector<8x32xf32>
    %361 = arith.addf %360, %359 : vector<8x32xf32>
    %362 = arith.divf %360, %361 : vector<8x32xf32>
    %363 = vector.extract_strided_slice %356 {offsets = [0, 32], sizes = [8, 32], strides = [1, 1]} : vector<8x128xf32> to vector<8x32xf32>
    %364 = arith.negf %363 : vector<8x32xf32>
    %365 = math.exp %364 : vector<8x32xf32>
    %cst_71 = arith.constant 1.000000e+00 : f32
    %366 = vector.broadcast %cst_71 : f32 to vector<8x32xf32>
    %367 = arith.addf %366, %365 : vector<8x32xf32>
    %368 = arith.divf %366, %367 : vector<8x32xf32>
    %369 = vector.extract_strided_slice %356 {offsets = [0, 64], sizes = [8, 32], strides = [1, 1]} : vector<8x128xf32> to vector<8x32xf32>
    %370 = math.tanh %369 : vector<8x32xf32>
    %371 = vector.extract_strided_slice %356 {offsets = [0, 96], sizes = [8, 32], strides = [1, 1]} : vector<8x128xf32> to vector<8x32xf32>
    %372 = arith.negf %371 : vector<8x32xf32>
    %373 = math.exp %372 : vector<8x32xf32>
    %cst_72 = arith.constant 1.000000e+00 : f32
    %374 = vector.broadcast %cst_72 : f32 to vector<8x32xf32>
    %375 = arith.addf %374, %373 : vector<8x32xf32>
    %376 = arith.divf %374, %375 : vector<8x32xf32>
    %377 = arith.mulf %368, %319 : vector<8x32xf32>
    %378 = arith.mulf %362, %370 : vector<8x32xf32>
    %379 = arith.addf %377, %378 : vector<8x32xf32>
    %380 = math.tanh %379 : vector<8x32xf32>
    %381 = arith.mulf %376, %380 : vector<8x32xf32>
    %382 = tpu.concatenate %352, %350, %381, %379 in 1 : vector<8x32xf32>, vector<8x32xf32>, vector<8x32xf32>, vector<8x32xf32> -> vector<8x128xf32>
    %383 = vector.shape_cast %321 : vector<8x1xi1> to vector<8x1xi1>
    %384 = vector.broadcast %383 : vector<8x1xi1> to vector<8x128xi1>
    %385 = arith.select %384, %382, %309 : vector<8x128xi1>, vector<8x128xf32>
    %cst_73 = arith.constant 0.000000e+00 : f32
    %386 = vector.broadcast %cst_73 : f32 to vector<8x32xf32>
    %387 = vector.shape_cast %321 : vector<8x1xi1> to vector<8x1xi1>
    %388 = vector.broadcast %387 : vector<8x1xi1> to vector<8x32xi1>
    %389 = arith.select %388, %381, %386 : vector<8x32xi1>, vector<8x32xf32>
    %390 = arith.index_cast %323 : i32 to index
    %c0_74 = arith.constant 0 : index
    %391 = vector.load %arg14[%390, %c0_74] : memref<64x32xf32, #tpu.memory_space<vmem>>, vector<8x32xf32>
    tpu.vector_store %arg14[%390, %c0_74], %389 {strides = array<i32>} : memref<64x32xf32, #tpu.memory_space<vmem>>, vector<8x32xf32>,
    %c5_i32 = arith.constant 5 : i32
    %392 = vector.extract_strided_slice %385 {offsets = [0, 0], sizes = [8, 32], strides = [1, 1]} : vector<8x128xf32> to vector<8x32xf32>
    %393 = vector.extract_strided_slice %385 {offsets = [0, 32], sizes = [8, 32], strides = [1, 1]} : vector<8x128xf32> to vector<8x32xf32>
    %394 = vector.extract_strided_slice %385 {offsets = [0, 64], sizes = [8, 32], strides = [1, 1]} : vector<8x128xf32> to vector<8x32xf32>
    %395 = vector.extract_strided_slice %385 {offsets = [0, 96], sizes = [8, 32], strides = [1, 1]} : vector<8x128xf32> to vector<8x32xf32>
    %396 = vector.broadcast %c5_i32 : i32 to vector<8x1xi32>
    %397 = arith.cmpi slt, %396, %7 : vector<8x1xi32>
    %c8_i32_75 = arith.constant 8 : i32
    %398 = arith.muli %c5_i32, %c8_i32_75 : i32
    %399 = tpu.assume_multiple %398, 8 : i32
    %400 = arith.index_cast %399 : i32 to index
    %c0_76 = arith.constant 0 : index
    %401 = vector.load %arg13[%400, %c0_76] : memref<64x128xf32, #tpu.memory_space<vmem>>, vector<8x128xf32>
    %cst_77 = arith.constant dense<0.000000e+00> : vector<8x128xf32>
    %402 = tpu.matmul %392, %8, %cst_77 {dimension_numbers = #tpu.dot_dimension_numbers<[1], [0], [0], [1], [0, 0, 1, 1], [], []>} : vector<8x32xf32>, vector<32x128xf32>, vector<8x128xf32> -> vector<8x128xf32>
    %403 = arith.addf %401, %402 : vector<8x128xf32>
    %404 = vector.extract_strided_slice %403 {offsets = [0, 0], sizes = [8, 32], strides = [1, 1]} : vector<8x128xf32> to vector<8x32xf32>
    %405 = arith.negf %404 : vector<8x32xf32>
    %406 = math.exp %405 : vector<8x32xf32>
    %cst_78 = arith.constant 1.000000e+00 : f32
    %407 = vector.broadcast %cst_78 : f32 to vector<8x32xf32>
    %408 = arith.addf %407, %406 : vector<8x32xf32>
    %409 = arith.divf %407, %408 : vector<8x32xf32>
    %410 = vector.extract_strided_slice %403 {offsets = [0, 32], sizes = [8, 32], strides = [1, 1]} : vector<8x128xf32> to vector<8x32xf32>
    %411 = arith.negf %410 : vector<8x32xf32>
    %412 = math.exp %411 : vector<8x32xf32>
    %cst_79 = arith.constant 1.000000e+00 : f32
    %413 = vector.broadcast %cst_79 : f32 to vector<8x32xf32>
    %414 = arith.addf %413, %412 : vector<8x32xf32>
    %415 = arith.divf %413, %414 : vector<8x32xf32>
    %416 = vector.extract_strided_slice %403 {offsets = [0, 64], sizes = [8, 32], strides = [1, 1]} : vector<8x128xf32> to vector<8x32xf32>
    %417 = math.tanh %416 : vector<8x32xf32>
    %418 = vector.extract_strided_slice %403 {offsets = [0, 96], sizes = [8, 32], strides = [1, 1]} : vector<8x128xf32> to vector<8x32xf32>
    %419 = arith.negf %418 : vector<8x32xf32>
    %420 = math.exp %419 : vector<8x32xf32>
    %cst_80 = arith.constant 1.000000e+00 : f32
    %421 = vector.broadcast %cst_80 : f32 to vector<8x32xf32>
    %422 = arith.addf %421, %420 : vector<8x32xf32>
    %423 = arith.divf %421, %422 : vector<8x32xf32>
    %424 = arith.mulf %415, %393 : vector<8x32xf32>
    %425 = arith.mulf %409, %417 : vector<8x32xf32>
    %426 = arith.addf %424, %425 : vector<8x32xf32>
    %427 = math.tanh %426 : vector<8x32xf32>
    %428 = arith.mulf %423, %427 : vector<8x32xf32>
    %429 = tpu.concatenate %428, %394 in 1 : vector<8x32xf32>, vector<8x32xf32> -> vector<8x64xf32>
    %cst_81 = arith.constant dense<0.000000e+00> : vector<8x128xf32>
    %430 = tpu.matmul %429, %9, %cst_81 {dimension_numbers = #tpu.dot_dimension_numbers<[1], [0], [0], [1], [0, 0, 1, 1], [], []>} : vector<8x64xf32>, vector<64x128xf32>, vector<8x128xf32> -> vector<8x128xf32>
    %431 = vector.broadcast %10 : vector<1x128xf32> to vector<8x128xf32>
    %432 = arith.addf %430, %431 : vector<8x128xf32>
    %433 = vector.extract_strided_slice %432 {offsets = [0, 0], sizes = [8, 32], strides = [1, 1]} : vector<8x128xf32> to vector<8x32xf32>
    %434 = arith.negf %433 : vector<8x32xf32>
    %435 = math.exp %434 : vector<8x32xf32>
    %cst_82 = arith.constant 1.000000e+00 : f32
    %436 = vector.broadcast %cst_82 : f32 to vector<8x32xf32>
    %437 = arith.addf %436, %435 : vector<8x32xf32>
    %438 = arith.divf %436, %437 : vector<8x32xf32>
    %439 = vector.extract_strided_slice %432 {offsets = [0, 32], sizes = [8, 32], strides = [1, 1]} : vector<8x128xf32> to vector<8x32xf32>
    %440 = arith.negf %439 : vector<8x32xf32>
    %441 = math.exp %440 : vector<8x32xf32>
    %cst_83 = arith.constant 1.000000e+00 : f32
    %442 = vector.broadcast %cst_83 : f32 to vector<8x32xf32>
    %443 = arith.addf %442, %441 : vector<8x32xf32>
    %444 = arith.divf %442, %443 : vector<8x32xf32>
    %445 = vector.extract_strided_slice %432 {offsets = [0, 64], sizes = [8, 32], strides = [1, 1]} : vector<8x128xf32> to vector<8x32xf32>
    %446 = math.tanh %445 : vector<8x32xf32>
    %447 = vector.extract_strided_slice %432 {offsets = [0, 96], sizes = [8, 32], strides = [1, 1]} : vector<8x128xf32> to vector<8x32xf32>
    %448 = arith.negf %447 : vector<8x32xf32>
    %449 = math.exp %448 : vector<8x32xf32>
    %cst_84 = arith.constant 1.000000e+00 : f32
    %450 = vector.broadcast %cst_84 : f32 to vector<8x32xf32>
    %451 = arith.addf %450, %449 : vector<8x32xf32>
    %452 = arith.divf %450, %451 : vector<8x32xf32>
    %453 = arith.mulf %444, %395 : vector<8x32xf32>
    %454 = arith.mulf %438, %446 : vector<8x32xf32>
    %455 = arith.addf %453, %454 : vector<8x32xf32>
    %456 = math.tanh %455 : vector<8x32xf32>
    %457 = arith.mulf %452, %456 : vector<8x32xf32>
    %458 = tpu.concatenate %428, %426, %457, %455 in 1 : vector<8x32xf32>, vector<8x32xf32>, vector<8x32xf32>, vector<8x32xf32> -> vector<8x128xf32>
    %459 = vector.shape_cast %397 : vector<8x1xi1> to vector<8x1xi1>
    %460 = vector.broadcast %459 : vector<8x1xi1> to vector<8x128xi1>
    %461 = arith.select %460, %458, %385 : vector<8x128xi1>, vector<8x128xf32>
    %cst_85 = arith.constant 0.000000e+00 : f32
    %462 = vector.broadcast %cst_85 : f32 to vector<8x32xf32>
    %463 = vector.shape_cast %397 : vector<8x1xi1> to vector<8x1xi1>
    %464 = vector.broadcast %463 : vector<8x1xi1> to vector<8x32xi1>
    %465 = arith.select %464, %457, %462 : vector<8x32xi1>, vector<8x32xf32>
    %466 = arith.index_cast %399 : i32 to index
    %c0_86 = arith.constant 0 : index
    %467 = vector.load %arg14[%466, %c0_86] : memref<64x32xf32, #tpu.memory_space<vmem>>, vector<8x32xf32>
    tpu.vector_store %arg14[%466, %c0_86], %465 {strides = array<i32>} : memref<64x32xf32, #tpu.memory_space<vmem>>, vector<8x32xf32>,
    %c6_i32 = arith.constant 6 : i32
    %468 = vector.extract_strided_slice %461 {offsets = [0, 0], sizes = [8, 32], strides = [1, 1]} : vector<8x128xf32> to vector<8x32xf32>
    %469 = vector.extract_strided_slice %461 {offsets = [0, 32], sizes = [8, 32], strides = [1, 1]} : vector<8x128xf32> to vector<8x32xf32>
    %470 = vector.extract_strided_slice %461 {offsets = [0, 64], sizes = [8, 32], strides = [1, 1]} : vector<8x128xf32> to vector<8x32xf32>
    %471 = vector.extract_strided_slice %461 {offsets = [0, 96], sizes = [8, 32], strides = [1, 1]} : vector<8x128xf32> to vector<8x32xf32>
    %472 = vector.broadcast %c6_i32 : i32 to vector<8x1xi32>
    %473 = arith.cmpi slt, %472, %7 : vector<8x1xi32>
    %c8_i32_87 = arith.constant 8 : i32
    %474 = arith.muli %c6_i32, %c8_i32_87 : i32
    %475 = tpu.assume_multiple %474, 8 : i32
    %476 = arith.index_cast %475 : i32 to index
    %c0_88 = arith.constant 0 : index
    %477 = vector.load %arg13[%476, %c0_88] : memref<64x128xf32, #tpu.memory_space<vmem>>, vector<8x128xf32>
    %cst_89 = arith.constant dense<0.000000e+00> : vector<8x128xf32>
    %478 = tpu.matmul %468, %8, %cst_89 {dimension_numbers = #tpu.dot_dimension_numbers<[1], [0], [0], [1], [0, 0, 1, 1], [], []>} : vector<8x32xf32>, vector<32x128xf32>, vector<8x128xf32> -> vector<8x128xf32>
    %479 = arith.addf %477, %478 : vector<8x128xf32>
    %480 = vector.extract_strided_slice %479 {offsets = [0, 0], sizes = [8, 32], strides = [1, 1]} : vector<8x128xf32> to vector<8x32xf32>
    %481 = arith.negf %480 : vector<8x32xf32>
    %482 = math.exp %481 : vector<8x32xf32>
    %cst_90 = arith.constant 1.000000e+00 : f32
    %483 = vector.broadcast %cst_90 : f32 to vector<8x32xf32>
    %484 = arith.addf %483, %482 : vector<8x32xf32>
    %485 = arith.divf %483, %484 : vector<8x32xf32>
    %486 = vector.extract_strided_slice %479 {offsets = [0, 32], sizes = [8, 32], strides = [1, 1]} : vector<8x128xf32> to vector<8x32xf32>
    %487 = arith.negf %486 : vector<8x32xf32>
    %488 = math.exp %487 : vector<8x32xf32>
    %cst_91 = arith.constant 1.000000e+00 : f32
    %489 = vector.broadcast %cst_91 : f32 to vector<8x32xf32>
    %490 = arith.addf %489, %488 : vector<8x32xf32>
    %491 = arith.divf %489, %490 : vector<8x32xf32>
    %492 = vector.extract_strided_slice %479 {offsets = [0, 64], sizes = [8, 32], strides = [1, 1]} : vector<8x128xf32> to vector<8x32xf32>
    %493 = math.tanh %492 : vector<8x32xf32>
    %494 = vector.extract_strided_slice %479 {offsets = [0, 96], sizes = [8, 32], strides = [1, 1]} : vector<8x128xf32> to vector<8x32xf32>
    %495 = arith.negf %494 : vector<8x32xf32>
    %496 = math.exp %495 : vector<8x32xf32>
    %cst_92 = arith.constant 1.000000e+00 : f32
    %497 = vector.broadcast %cst_92 : f32 to vector<8x32xf32>
    %498 = arith.addf %497, %496 : vector<8x32xf32>
    %499 = arith.divf %497, %498 : vector<8x32xf32>
    %500 = arith.mulf %491, %469 : vector<8x32xf32>
    %501 = arith.mulf %485, %493 : vector<8x32xf32>
    %502 = arith.addf %500, %501 : vector<8x32xf32>
    %503 = math.tanh %502 : vector<8x32xf32>
    %504 = arith.mulf %499, %503 : vector<8x32xf32>
    %505 = tpu.concatenate %504, %470 in 1 : vector<8x32xf32>, vector<8x32xf32> -> vector<8x64xf32>
    %cst_93 = arith.constant dense<0.000000e+00> : vector<8x128xf32>
    %506 = tpu.matmul %505, %9, %cst_93 {dimension_numbers = #tpu.dot_dimension_numbers<[1], [0], [0], [1], [0, 0, 1, 1], [], []>} : vector<8x64xf32>, vector<64x128xf32>, vector<8x128xf32> -> vector<8x128xf32>
    %507 = vector.broadcast %10 : vector<1x128xf32> to vector<8x128xf32>
    %508 = arith.addf %506, %507 : vector<8x128xf32>
    %509 = vector.extract_strided_slice %508 {offsets = [0, 0], sizes = [8, 32], strides = [1, 1]} : vector<8x128xf32> to vector<8x32xf32>
    %510 = arith.negf %509 : vector<8x32xf32>
    %511 = math.exp %510 : vector<8x32xf32>
    %cst_94 = arith.constant 1.000000e+00 : f32
    %512 = vector.broadcast %cst_94 : f32 to vector<8x32xf32>
    %513 = arith.addf %512, %511 : vector<8x32xf32>
    %514 = arith.divf %512, %513 : vector<8x32xf32>
    %515 = vector.extract_strided_slice %508 {offsets = [0, 32], sizes = [8, 32], strides = [1, 1]} : vector<8x128xf32> to vector<8x32xf32>
    %516 = arith.negf %515 : vector<8x32xf32>
    %517 = math.exp %516 : vector<8x32xf32>
    %cst_95 = arith.constant 1.000000e+00 : f32
    %518 = vector.broadcast %cst_95 : f32 to vector<8x32xf32>
    %519 = arith.addf %518, %517 : vector<8x32xf32>
    %520 = arith.divf %518, %519 : vector<8x32xf32>
    %521 = vector.extract_strided_slice %508 {offsets = [0, 64], sizes = [8, 32], strides = [1, 1]} : vector<8x128xf32> to vector<8x32xf32>
    %522 = math.tanh %521 : vector<8x32xf32>
    %523 = vector.extract_strided_slice %508 {offsets = [0, 96], sizes = [8, 32], strides = [1, 1]} : vector<8x128xf32> to vector<8x32xf32>
    %524 = arith.negf %523 : vector<8x32xf32>
    %525 = math.exp %524 : vector<8x32xf32>
    %cst_96 = arith.constant 1.000000e+00 : f32
    %526 = vector.broadcast %cst_96 : f32 to vector<8x32xf32>
    %527 = arith.addf %526, %525 : vector<8x32xf32>
    %528 = arith.divf %526, %527 : vector<8x32xf32>
    %529 = arith.mulf %520, %471 : vector<8x32xf32>
    %530 = arith.mulf %514, %522 : vector<8x32xf32>
    %531 = arith.addf %529, %530 : vector<8x32xf32>
    %532 = math.tanh %531 : vector<8x32xf32>
    %533 = arith.mulf %528, %532 : vector<8x32xf32>
    %534 = tpu.concatenate %504, %502, %533, %531 in 1 : vector<8x32xf32>, vector<8x32xf32>, vector<8x32xf32>, vector<8x32xf32> -> vector<8x128xf32>
    %535 = vector.shape_cast %473 : vector<8x1xi1> to vector<8x1xi1>
    %536 = vector.broadcast %535 : vector<8x1xi1> to vector<8x128xi1>
    %537 = arith.select %536, %534, %461 : vector<8x128xi1>, vector<8x128xf32>
    %cst_97 = arith.constant 0.000000e+00 : f32
    %538 = vector.broadcast %cst_97 : f32 to vector<8x32xf32>
    %539 = vector.shape_cast %473 : vector<8x1xi1> to vector<8x1xi1>
    %540 = vector.broadcast %539 : vector<8x1xi1> to vector<8x32xi1>
    %541 = arith.select %540, %533, %538 : vector<8x32xi1>, vector<8x32xf32>
    %542 = arith.index_cast %475 : i32 to index
    %c0_98 = arith.constant 0 : index
    %543 = vector.load %arg14[%542, %c0_98] : memref<64x32xf32, #tpu.memory_space<vmem>>, vector<8x32xf32>
    tpu.vector_store %arg14[%542, %c0_98], %541 {strides = array<i32>} : memref<64x32xf32, #tpu.memory_space<vmem>>, vector<8x32xf32>,
    %c7_i32 = arith.constant 7 : i32
    %544 = vector.extract_strided_slice %537 {offsets = [0, 0], sizes = [8, 32], strides = [1, 1]} : vector<8x128xf32> to vector<8x32xf32>
    %545 = vector.extract_strided_slice %537 {offsets = [0, 32], sizes = [8, 32], strides = [1, 1]} : vector<8x128xf32> to vector<8x32xf32>
    %546 = vector.extract_strided_slice %537 {offsets = [0, 64], sizes = [8, 32], strides = [1, 1]} : vector<8x128xf32> to vector<8x32xf32>
    %547 = vector.extract_strided_slice %537 {offsets = [0, 96], sizes = [8, 32], strides = [1, 1]} : vector<8x128xf32> to vector<8x32xf32>
    %548 = vector.broadcast %c7_i32 : i32 to vector<8x1xi32>
    %549 = arith.cmpi slt, %548, %7 : vector<8x1xi32>
    %c8_i32_99 = arith.constant 8 : i32
    %550 = arith.muli %c7_i32, %c8_i32_99 : i32
    %551 = tpu.assume_multiple %550, 8 : i32
    %552 = arith.index_cast %551 : i32 to index
    %c0_100 = arith.constant 0 : index
    %553 = vector.load %arg13[%552, %c0_100] : memref<64x128xf32, #tpu.memory_space<vmem>>, vector<8x128xf32>
    %cst_101 = arith.constant dense<0.000000e+00> : vector<8x128xf32>
    %554 = tpu.matmul %544, %8, %cst_101 {dimension_numbers = #tpu.dot_dimension_numbers<[1], [0], [0], [1], [0, 0, 1, 1], [], []>} : vector<8x32xf32>, vector<32x128xf32>, vector<8x128xf32> -> vector<8x128xf32>
    %555 = arith.addf %553, %554 : vector<8x128xf32>
    %556 = vector.extract_strided_slice %555 {offsets = [0, 0], sizes = [8, 32], strides = [1, 1]} : vector<8x128xf32> to vector<8x32xf32>
    %557 = arith.negf %556 : vector<8x32xf32>
    %558 = math.exp %557 : vector<8x32xf32>
    %cst_102 = arith.constant 1.000000e+00 : f32
    %559 = vector.broadcast %cst_102 : f32 to vector<8x32xf32>
    %560 = arith.addf %559, %558 : vector<8x32xf32>
    %561 = arith.divf %559, %560 : vector<8x32xf32>
    %562 = vector.extract_strided_slice %555 {offsets = [0, 32], sizes = [8, 32], strides = [1, 1]} : vector<8x128xf32> to vector<8x32xf32>
    %563 = arith.negf %562 : vector<8x32xf32>
    %564 = math.exp %563 : vector<8x32xf32>
    %cst_103 = arith.constant 1.000000e+00 : f32
    %565 = vector.broadcast %cst_103 : f32 to vector<8x32xf32>
    %566 = arith.addf %565, %564 : vector<8x32xf32>
    %567 = arith.divf %565, %566 : vector<8x32xf32>
    %568 = vector.extract_strided_slice %555 {offsets = [0, 64], sizes = [8, 32], strides = [1, 1]} : vector<8x128xf32> to vector<8x32xf32>
    %569 = math.tanh %568 : vector<8x32xf32>
    %570 = vector.extract_strided_slice %555 {offsets = [0, 96], sizes = [8, 32], strides = [1, 1]} : vector<8x128xf32> to vector<8x32xf32>
    %571 = arith.negf %570 : vector<8x32xf32>
    %572 = math.exp %571 : vector<8x32xf32>
    %cst_104 = arith.constant 1.000000e+00 : f32
    %573 = vector.broadcast %cst_104 : f32 to vector<8x32xf32>
    %574 = arith.addf %573, %572 : vector<8x32xf32>
    %575 = arith.divf %573, %574 : vector<8x32xf32>
    %576 = arith.mulf %567, %545 : vector<8x32xf32>
    %577 = arith.mulf %561, %569 : vector<8x32xf32>
    %578 = arith.addf %576, %577 : vector<8x32xf32>
    %579 = math.tanh %578 : vector<8x32xf32>
    %580 = arith.mulf %575, %579 : vector<8x32xf32>
    %581 = tpu.concatenate %580, %546 in 1 : vector<8x32xf32>, vector<8x32xf32> -> vector<8x64xf32>
    %cst_105 = arith.constant dense<0.000000e+00> : vector<8x128xf32>
    %582 = tpu.matmul %581, %9, %cst_105 {dimension_numbers = #tpu.dot_dimension_numbers<[1], [0], [0], [1], [0, 0, 1, 1], [], []>} : vector<8x64xf32>, vector<64x128xf32>, vector<8x128xf32> -> vector<8x128xf32>
    %583 = vector.broadcast %10 : vector<1x128xf32> to vector<8x128xf32>
    %584 = arith.addf %582, %583 : vector<8x128xf32>
    %585 = vector.extract_strided_slice %584 {offsets = [0, 0], sizes = [8, 32], strides = [1, 1]} : vector<8x128xf32> to vector<8x32xf32>
    %586 = arith.negf %585 : vector<8x32xf32>
    %587 = math.exp %586 : vector<8x32xf32>
    %cst_106 = arith.constant 1.000000e+00 : f32
    %588 = vector.broadcast %cst_106 : f32 to vector<8x32xf32>
    %589 = arith.addf %588, %587 : vector<8x32xf32>
    %590 = arith.divf %588, %589 : vector<8x32xf32>
    %591 = vector.extract_strided_slice %584 {offsets = [0, 32], sizes = [8, 32], strides = [1, 1]} : vector<8x128xf32> to vector<8x32xf32>
    %592 = arith.negf %591 : vector<8x32xf32>
    %593 = math.exp %592 : vector<8x32xf32>
    %cst_107 = arith.constant 1.000000e+00 : f32
    %594 = vector.broadcast %cst_107 : f32 to vector<8x32xf32>
    %595 = arith.addf %594, %593 : vector<8x32xf32>
    %596 = arith.divf %594, %595 : vector<8x32xf32>
    %597 = vector.extract_strided_slice %584 {offsets = [0, 64], sizes = [8, 32], strides = [1, 1]} : vector<8x128xf32> to vector<8x32xf32>
    %598 = math.tanh %597 : vector<8x32xf32>
    %599 = vector.extract_strided_slice %584 {offsets = [0, 96], sizes = [8, 32], strides = [1, 1]} : vector<8x128xf32> to vector<8x32xf32>
    %600 = arith.negf %599 : vector<8x32xf32>
    %601 = math.exp %600 : vector<8x32xf32>
    %cst_108 = arith.constant 1.000000e+00 : f32
    %602 = vector.broadcast %cst_108 : f32 to vector<8x32xf32>
    %603 = arith.addf %602, %601 : vector<8x32xf32>
    %604 = arith.divf %602, %603 : vector<8x32xf32>
    %605 = arith.mulf %596, %547 : vector<8x32xf32>
    %606 = arith.mulf %590, %598 : vector<8x32xf32>
    %607 = arith.addf %605, %606 : vector<8x32xf32>
    %608 = math.tanh %607 : vector<8x32xf32>
    %609 = arith.mulf %604, %608 : vector<8x32xf32>
    %610 = tpu.concatenate %580, %578, %609, %607 in 1 : vector<8x32xf32>, vector<8x32xf32>, vector<8x32xf32>, vector<8x32xf32> -> vector<8x128xf32>
    %611 = vector.shape_cast %549 : vector<8x1xi1> to vector<8x1xi1>
    %612 = vector.broadcast %611 : vector<8x1xi1> to vector<8x128xi1>
    %613 = arith.select %612, %610, %537 : vector<8x128xi1>, vector<8x128xf32>
    %cst_109 = arith.constant 0.000000e+00 : f32
    %614 = vector.broadcast %cst_109 : f32 to vector<8x32xf32>
    %615 = vector.shape_cast %549 : vector<8x1xi1> to vector<8x1xi1>
    %616 = vector.broadcast %615 : vector<8x1xi1> to vector<8x32xi1>
    %617 = arith.select %616, %609, %614 : vector<8x32xi1>, vector<8x32xf32>
    %618 = arith.index_cast %551 : i32 to index
    %c0_110 = arith.constant 0 : index
    %619 = vector.load %arg14[%618, %c0_110] : memref<64x32xf32, #tpu.memory_space<vmem>>, vector<8x32xf32>
    tpu.vector_store %arg14[%618, %c0_110], %617 {strides = array<i32>} : memref<64x32xf32, #tpu.memory_space<vmem>>, vector<8x32xf32>,
    %c8_i32_111 = arith.constant 8 : i32
    %c0_112 = arith.constant 0 : index
    %c0_113 = arith.constant 0 : index
    %620 = vector.load %arg14[%c0_112, %c0_113] : memref<64x32xf32, #tpu.memory_space<vmem>>, vector<64x32xf32>
    %c0_114 = arith.constant 0 : index
    %c0_115 = arith.constant 0 : index
    %621 = vector.load %arg8[%c0_114, %c0_115] : memref<32x128xf32, #tpu.memory_space<vmem>>, vector<32x128xf32>
    %cst_116 = arith.constant dense<0.000000e+00> : vector<64x128xf32>
    %622 = tpu.matmul %620, %621, %cst_116 {dimension_numbers = #tpu.dot_dimension_numbers<[1], [0], [0], [1], [0, 0, 1, 1], [], []>} : vector<64x32xf32>, vector<32x128xf32>, vector<64x128xf32> -> vector<64x128xf32>
    %c0_117 = arith.constant 0 : index
    %c0_118 = arith.constant 0 : index
    %623 = vector.load %arg9[%c0_117, %c0_118] : memref<1x128xf32, #tpu.memory_space<vmem>>, vector<1x128xf32>
    %624 = vector.broadcast %623 : vector<1x128xf32> to vector<64x128xf32>
    %625 = arith.addf %622, %624 : vector<64x128xf32>
    %c0_119 = arith.constant 0 : index
    %c0_120 = arith.constant 0 : index
    %626 = vector.load %arg10[%c0_119, %c0_120] : memref<64x128xf32, #tpu.memory_space<vmem>>, vector<64x128xf32>
    tpu.vector_store %arg10[%c0_119, %c0_120], %625 {strides = array<i32>} : memref<64x128xf32, #tpu.memory_space<vmem>>, vector<64x128xf32>,
    %627 = vector.extract_strided_slice %613 {offsets = [0, 0], sizes = [8, 32], strides = [1, 1]} : vector<8x128xf32> to vector<8x32xf32>
    %c0_121 = arith.constant 0 : index
    %c0_122 = arith.constant 0 : index
    %c0_123 = arith.constant 0 : index
    %628 = vector.load %arg11[%c0_121, %c0_122, %c0_123] : memref<2x8x32xf32, #tpu.memory_space<vmem>>, vector<1x8x32xf32>
    %629 = vector.shape_cast %628 : vector<1x8x32xf32> to vector<8x32xf32>
    %630 = vector.shape_cast %627 : vector<8x32xf32> to vector<1x8x32xf32>
    tpu.vector_store %arg11[%c0_121, %c0_122, %c0_123], %630 {strides = array<i32>} : memref<2x8x32xf32, #tpu.memory_space<vmem>>, vector<1x8x32xf32>,
    %631 = vector.extract_strided_slice %613 {offsets = [0, 64], sizes = [8, 32], strides = [1, 1]} : vector<8x128xf32> to vector<8x32xf32>
    %c1 = arith.constant 1 : index
    %c0_124 = arith.constant 0 : index
    %c0_125 = arith.constant 0 : index
    %632 = vector.load %arg11[%c1, %c0_124, %c0_125] : memref<2x8x32xf32, #tpu.memory_space<vmem>>, vector<1x8x32xf32>
    %633 = vector.shape_cast %632 : vector<1x8x32xf32> to vector<8x32xf32>
    %634 = vector.shape_cast %631 : vector<8x32xf32> to vector<1x8x32xf32>
    tpu.vector_store %arg11[%c1, %c0_124, %c0_125], %634 {strides = array<i32>} : memref<2x8x32xf32, #tpu.memory_space<vmem>>, vector<1x8x32xf32>,
    %635 = vector.extract_strided_slice %613 {offsets = [0, 32], sizes = [8, 32], strides = [1, 1]} : vector<8x128xf32> to vector<8x32xf32>
    %c0_126 = arith.constant 0 : index
    %c0_127 = arith.constant 0 : index
    %c0_128 = arith.constant 0 : index
    %636 = vector.load %arg12[%c0_126, %c0_127, %c0_128] : memref<2x8x32xf32, #tpu.memory_space<vmem>>, vector<1x8x32xf32>
    %637 = vector.shape_cast %636 : vector<1x8x32xf32> to vector<8x32xf32>
    %638 = vector.shape_cast %635 : vector<8x32xf32> to vector<1x8x32xf32>
    tpu.vector_store %arg12[%c0_126, %c0_127, %c0_128], %638 {strides = array<i32>} : memref<2x8x32xf32, #tpu.memory_space<vmem>>, vector<1x8x32xf32>,
    %639 = vector.extract_strided_slice %613 {offsets = [0, 96], sizes = [8, 32], strides = [1, 1]} : vector<8x128xf32> to vector<8x32xf32>
    %c1_129 = arith.constant 1 : index
    %c0_130 = arith.constant 0 : index
    %c0_131 = arith.constant 0 : index
    %640 = vector.load %arg12[%c1_129, %c0_130, %c0_131] : memref<2x8x32xf32, #tpu.memory_space<vmem>>, vector<1x8x32xf32>
    %641 = vector.shape_cast %640 : vector<1x8x32xf32> to vector<8x32xf32>
    %642 = vector.shape_cast %639 : vector<8x32xf32> to vector<1x8x32xf32>
    tpu.vector_store %arg12[%c1_129, %c0_130, %c0_131], %642 {strides = array<i32>} : memref<2x8x32xf32, #tpu.memory_space<vmem>>, vector<1x8x32xf32>,
    return
  }
  func.func @transform_0(%arg0: i32) -> (i32, i32) {
    %c0_i32 = arith.constant 0 : i32
    %c0_i32_0 = arith.constant 0 : i32
    %c0_i32_1 = arith.constant 0 : i32
    return %c0_i32, %c0_i32_0 : i32, i32
  }
  func.func @transform_1(%arg0: i32) -> (i32, i32) {
    %c0_i32 = arith.constant 0 : i32
    %c0_i32_0 = arith.constant 0 : i32
    %c0_i32_1 = arith.constant 0 : i32
    return %c0_i32, %c0_i32_0 : i32, i32
  }
  func.func @transform_2(%arg0: i32) -> (i32, i32) {
    %c0_i32 = arith.constant 0 : i32
    %c0_i32_0 = arith.constant 0 : i32
    %c0_i32_1 = arith.constant 0 : i32
    return %c0_i32, %c0_i32_0 : i32, i32
  }
  func.func @transform_3(%arg0: i32) -> (i32, i32) {
    %c0_i32 = arith.constant 0 : i32
    %c0_i32_0 = arith.constant 0 : i32
    %c0_i32_1 = arith.constant 0 : i32
    return %c0_i32, %c0_i32_0 : i32, i32
  }
  func.func @transform_4(%arg0: i32) -> (i32, i32) {
    %c0_i32 = arith.constant 0 : i32
    %c0_i32_0 = arith.constant 0 : i32
    %c0_i32_1 = arith.constant 0 : i32
    return %c0_i32, %c0_i32_0 : i32, i32
  }
  func.func @transform_5(%arg0: i32) -> (i32, i32) {
    %c0_i32 = arith.constant 0 : i32
    %c0_i32_0 = arith.constant 0 : i32
    %c0_i32_1 = arith.constant 0 : i32
    return %c0_i32, %c0_i32_0 : i32, i32
  }
  func.func @transform_6(%arg0: i32) -> (i32, i32) {
    %c0_i32 = arith.constant 0 : i32
    %c0_i32_0 = arith.constant 0 : i32
    %c0_i32_1 = arith.constant 0 : i32
    return %c0_i32, %c0_i32_0 : i32, i32
  }
  func.func @transform_7(%arg0: i32) -> (i32, i32) {
    %c0_i32 = arith.constant 0 : i32
    %c0_i32_0 = arith.constant 0 : i32
    %c0_i32_1 = arith.constant 0 : i32
    return %c0_i32, %c0_i32_0 : i32, i32
  }
  func.func @transform_8(%arg0: i32) -> (i32, i32) {
    %c0_i32 = arith.constant 0 : i32
    %c0_i32_0 = arith.constant 0 : i32
    %c0_i32_1 = arith.constant 0 : i32
    return %c0_i32, %c0_i32_0 : i32, i32
  }
  func.func @transform_9(%arg0: i32) -> (i32, i32) {
    %c0_i32 = arith.constant 0 : i32
    %c0_i32_0 = arith.constant 0 : i32
    %c0_i32_1 = arith.constant 0 : i32
    return %c0_i32, %c0_i32_0 : i32, i32
  }
  func.func @transform_10(%arg0: i32) -> (i32, i32, i32) {
    %c0_i32 = arith.constant 0 : i32
    %c0_i32_0 = arith.constant 0 : i32
    %c0_i32_1 = arith.constant 0 : i32
    %c0_i32_2 = arith.constant 0 : i32
    return %c0_i32, %c0_i32_0, %c0_i32_1 : i32, i32, i32
  }
  func.func @transform_11(%arg0: i32) -> (i32, i32, i32) {
    %c0_i32 = arith.constant 0 : i32
    %c0_i32_0 = arith.constant 0 : i32
    %c0_i32_1 = arith.constant 0 : i32
    %c0_i32_2 = arith.constant 0 : i32
    return %c0_i32, %c0_i32_0, %c0_i32_1 : i32, i32, i32
  }
}

</mosaic_0001>

<bundles_post_ra>
// kernel: tpu_custom_call.1
= control target key start
LH: loop header
LB: loop body
LE: loop exit
PB: predicated region body
PF: predicated region fallthrough
CT: control target
= control target key end

     0   :  { %17 = vsyncpa [#allocation5], 0  ;;  %s4062_s0 = inlined_call_operand.hbm [shape: f32[64,64], index: 0, kind: input, shape index: {}]   ;;  %s4063_s1 = inlined_call_operand.vmem [shape: s32[8,1], index: 1, kind: input, shape index: {}]   ;;  %s4064_s2 = inlined_call_operand.hbm [shape: f32[64,128], index: 2, kind: input, shape index: {}]   ;;  %s4065_s3 = inlined_call_operand.hbm [shape: f32[32,128], index: 3, kind: input, shape index: {}]   ;;  %s4066_s4 = inlined_call_operand.vmem [shape: f32[1,128], index: 4, kind: input, shape index: {}]   ;;  %s4067_s5 = inlined_call_operand.hbm [shape: f32[64,128], index: 5, kind: input, shape index: {}]   ;;  %s4068_s6 = inlined_call_operand.vmem [shape: f32[1,128], index: 6, kind: input, shape index: {}]   ;;  %s4069_s7 = inlined_call_operand.vmem [shape: f32[32,128], index: 7, kind: input, shape index: {}]   ;;  %s4070_s8 = inlined_call_operand.vmem [shape: f32[1,128], index: 8, kind: input, shape index: {}]   ;;  %s4071_s9 = inlined_call_operand.hbm [shape: f32[64,128], index: 9, kind: output, shape index: {0}]   ;;  %s4072_s10 = inlined_call_operand.hbm [shape: f32[2,8,32], index: 10, kind: output, shape index: {1}]   ;;  %s4073_s11 = inlined_call_operand.hbm [shape: f32[2,8,32], index: 11, kind: output, shape index: {2}]  }
   0x1   :  { %18 = vsyncpa [#allocation8], 0 }
   0x2   :  { %19 = vsyncpa [#allocation11], 0 }
   0x3   :  { %20 = vsyncpa [#allocation6], 0 }
   0x4   :  { %21 = vsyncpa [#allocation14], 0  ;;  %s3312_s17 = smov [#allocation7]   ;;  %s3313_s19 = smov [#allocation4]  }
   0x5   :  { %s41_s18 = sshll.u32 %s3312_s17, 4  ;;  %s27_s20 = sshll.u32 %s3313_s19, 4  ;;  %s42_s18 = int_to_ptr.vmem [resolvable:$true] %s41_s18  ;;  %s3388_s20 = int_to_ptr.vmem [resolvable:$true] %s27_s20 }
   0x6   :  { %s3148_s23 = scalar_lea.hbm %s4064_s2, 1024 }
   0x7   :  { %p3149_p0 = scmp.ne.s32.totalorder %s4064_s2, %s3148_s23  ;;  %p3152_p1 = scmp.lt.u32.totalorder %s3148_s23, %s4064_s2 }
   0x9   :  { %p3154_p2 = pnand %p3152_p1, %p3149_p0 }
   0xb   :  { %3157 = shalt.err (!%p3154_p2)
}
   0xc   :  { %s3158_s28 = scalar_lea.vmem %s42_s18, 1024  ;;  %p3163_p4 = scmp.lt.s32.totalorder %s42_s18, %s42_s18 }
   0xd   :  { %p3159_p3 = scmp.ne.s32.totalorder %s42_s18, %s3158_s28  ;;  %p3164_p5 = scmp.lt.s32.totalorder %s3158_s28, %s3158_s28 }
   0xf   :  { %p3165_p6 = por %p3164_p5, %p3163_p4 }
  0x11   :  { %p3166_p7 = pnand %p3165_p6, %p3159_p3 }
  0x13   :  { %3169 = shalt.err (!%p3166_p7)
}
  0x14   :  { %s3314_s29 = smov 128   ;;  %s3315_s30 = smov 8  }
  0x15   :  { %47 = dma.hbm_to_vmem [thread:$0]  %s4064_s2, 1024, %s42_s18, [#allocation8], %s3314_s29, %s3314_s29, %s3315_s30  }
  0x16   :  { %s3170_s16 = scalar_lea.hbm %s4062_s0, 1024 }
  0x17   :  { %p3171_p8 = scmp.ne.s32.totalorder %s4062_s0, %s3170_s16  ;;  %p3174_p9 = scmp.lt.u32.totalorder %s3170_s16, %s4062_s0 }
  0x19   :  { %p3176_p10 = pnand %p3174_p9, %p3171_p8 }
  0x1b   :  { %3179 = shalt.err (!%p3176_p10)
}
  0x1c   :  { %s3180_s23 = scalar_lea.vmem %s3388_s20, 1024  ;;  %p3185_p12 = scmp.lt.s32.totalorder %s3388_s20, %s3388_s20 }
  0x1d   :  { %p3181_p11 = scmp.ne.s32.totalorder %s3388_s20, %s3180_s23  ;;  %p3186_p13 = scmp.lt.s32.totalorder %s3180_s23, %s3180_s23 }
  0x1f   :  { %p3187_p0 = por %p3186_p13, %p3185_p12 }
  0x21   :  { %p3188_p1 = pnand %p3187_p0, %p3181_p11 }
  0x23   :  { %3191 = shalt.err (!%p3188_p1)
}
  0x24   :  { %33 = dma.hbm_to_vmem [thread:$0]  %s4062_s0, 1024, %s3388_s20, [#allocation5], %s3314_s29, %s3314_s29, %s3315_s30  }
  0x25   :  { %s3316_s24 = smov [#allocation9]   ;;  %s3317_s26 = smov [#allocation10]  }
  0x26   :  { %s53_s25 = sshll.u32 %s3316_s24, 4  ;;  %s67_s27 = sshll.u32 %s3317_s26, 4  ;;  %s54_s25 = int_to_ptr.vmem [resolvable:$true] %s53_s25  ;;  %s3425_s27 = int_to_ptr.vmem [resolvable:$true] %s67_s27 }
  0x27   :  { %s3192_s13 = scalar_lea.hbm %s4065_s3, 512 }
  0x28   :  { %p3193_p2 = scmp.ne.s32.totalorder %s4065_s3, %s3192_s13  ;;  %p3196_p3 = scmp.lt.u32.totalorder %s3192_s13, %s4065_s3 }
  0x2a   :  { %p3198_p4 = pnand %p3196_p3, %p3193_p2 }
  0x2c   :  { %3201 = shalt.err (!%p3198_p4)
}
  0x2d   :  { %s3202_s0 = scalar_lea.vmem %s54_s25, 512  ;;  %p3207_p6 = scmp.lt.s32.totalorder %s54_s25, %s54_s25 }
  0x2e   :  { %p3203_p5 = scmp.ne.s32.totalorder %s54_s25, %s3202_s0  ;;  %p3208_p7 = scmp.lt.s32.totalorder %s3202_s0, %s3202_s0 }
  0x30   :  { %p3209_p8 = por %p3208_p7, %p3207_p6 }
  0x32   :  { %p3210_p9 = pnand %p3209_p8, %p3203_p5 }
  0x34   :  { %3213 = shalt.err (!%p3210_p9)
}
  0x35   :  { %59 = dma.hbm_to_vmem [thread:$0]  %s4065_s3, 512, %s54_s25, [#allocation8], %s3314_s29, %s3314_s29, %s3315_s30  }
  0x36   :  { %s3214_s23 = scalar_lea.hbm %s4067_s5, 1024 }
  0x37   :  { %p3215_p10 = scmp.ne.s32.totalorder %s4067_s5, %s3214_s23  ;;  %p3218_p11 = scmp.lt.u32.totalorder %s3214_s23, %s4067_s5 }
  0x39   :  { %p3220_p12 = pnand %p3218_p11, %p3215_p10 }
  0x3b   :  { %3223 = shalt.err (!%p3220_p12)
}
  0x3c   :  { %s3224_s28 = scalar_lea.vmem %s3425_s27, 1024  ;;  %p3229_p0 = scmp.lt.s32.totalorder %s3425_s27, %s3425_s27 }
  0x3d   :  { %p3225_p13 = scmp.ne.s32.totalorder %s3425_s27, %s3224_s28  ;;  %p3230_p1 = scmp.lt.s32.totalorder %s3224_s28, %s3224_s28 }
  0x3f   :  { %p3231_p2 = por %p3230_p1, %p3229_p0 }
  0x41   :  { %p3232_p3 = pnand %p3231_p2, %p3225_p13 }
  0x43   :  { %3235 = shalt.err (!%p3232_p3)
}
  0x44   :  { %73 = dma.hbm_to_vmem [thread:$0]  %s4067_s5, 1024, %s3425_s27, [#allocation11], %s3314_s29, %s3314_s29, %s3315_s30  }
  0x45   :  { %3302 = dma.done.wait [#allocation5], 1024  }
  0x46   :  { %3303 = vsyncadd [#allocation5], 4294966272 }
  0x47   :  { %3304 = dma.done.wait [#allocation8], 1536  }
  0x48   :  { %3305 = vsyncadd [#allocation8], 4294965760 }
  0x49   :  { %3306 = dma.done.wait [#allocation11], 1024  }
  0x4a   :  { %3307 = vsyncadd [#allocation11], 4294966272  ;;  %v3318_v0 = vmov 0.0|0.0   ;;  %vm3319_vm0 = vmmov 0   ;;  %v3320_v1 = vmov 0.0   ;;  %v100_v2 = vld [vmem:[#allocation7] sm:$0xff] }
  0x4b   :  { %2847 = vmatprep.subr.bf16.mxu1 %v3318_v0  ;;  %2579 = vmatprep.mubr.msk.f32.mxu1 %vm3319_vm0, %v3320_v1  ;;  %v101_v3 = vld [vmem:[#allocation7 + $0x8] sm:$0xff]  ;;  %v102_v4 = vld [vmem:[#allocation7 + $0x10] sm:$0xff]  ;;  %v103_v6 = vld [vmem:[#allocation7 + $0x18] sm:$0xff]  ;;  %vm115_vm1 = vcmask 523264   ;;  %s3321_s12 = smov 64   ;;  %s3322_s13 = smov 32  }
  0x4c   :  { %v2831_v5 = vpack.c.bf16 %v101_v3, %v100_v2  ;;  %v104_v7 = vld [vmem:[#allocation7 + $0x20] sm:$0xff]  ;;  %v2835_v8 = vpack.c.bf16 %v103_v6, %v102_v4  ;;  %v105_v9 = vld [vmem:[#allocation7 + $0x28] sm:$0xff]  ;;  %v256_v14 = vld [vmem:[#allocation9 + $0x10] sm:$0xff]  ;;  %vm269_vm2 = vcmask 261120   ;;  %v3323_v60 = vmov 0   ;;  %s3324_s0 = smov 96  }
  0x4d   :  { %v254_v10 = vld [vmem:[#allocation9] sm:$0xff]  ;;  %v255_v11 = vld [vmem:[#allocation9 + $0x8] sm:$0xff]  ;;  %v257_v15 = vld [vmem:[#allocation9 + $0x18] sm:$0xff]  ;;  %v2839_v16 = vpack.c.bf16 %v105_v9, %v104_v7  ;;  %3015 = vset.pattern.permute.xlu1 %v3323_v60  ;;  %3016 = vset.pattern.permute.xlu0 %v3323_v60  ;;  %vm486_vm4 = vcmask 785408   ;;  %s3325_s5 = smov [#allocation13]  }
  0x4e   :  { %2832 = vmatprep.subr.bf16.mxu0 %v2831_v5  ;;  %v3465_v12 = vpack.c.bf16 %v255_v11, %v254_v10  ;;  %v92_v13 = vld [vmem:[#allocation4] sm:$0xff]  ;;  %v3469_v17 = vpack.c.bf16 %v257_v15, %v256_v14  ;;  %v106_v18 = vld [vmem:[#allocation7 + $0x30] sm:$0xff]  ;;  %v107_v19 = vld [vmem:[#allocation7 + $0x38] sm:$0xff]  ;;  %s2320_s27 = sshll.u32 %s3325_s5, 4  ;;  %s2321_s27 = int_to_ptr.vmem [resolvable:$true] %s2320_s27 }
  0x4f   :  { %2834 = vmatpush3.bf16.msra.mxu0 %v2831_v5  ;;  %2559 = vmatprep.mubr.msk.f32.mxu0 %vm115_vm1, %v92_v13  ;;  %v2843_v20 = vpack.c.bf16 %v107_v19, %v106_v18  ;;  %v93_v21 = vld [vmem:[#allocation4 + $0x8] sm:$0xff]  ;;  %v3486_v24 = vld [vmem:[%s4066_s4] ss:$0 sm:$0xff]  ;;  %v260_v41 = vld [vmem:[#allocation10 + $0x10] sm:$0xff]  ;;  %p3241_p5 = scmp.lt.s32.totalorder %s2321_s27, %s2321_s27 }
  0x50   :  { %2836 = vmatprep.subr.bf16.mxu0 %v2835_v8  ;;  %2849 = vmatpush3.bf16.msra.mxu1 %v3465_v12  ;;  %v258_v39 = vld [vmem:[#allocation10] sm:$0xff]  ;;  %v259_v40 = vld [vmem:[#allocation10 + $0x8] sm:$0xff]  ;;  %v261_v43 = vld [vmem:[#allocation10 + $0x18] sm:$0xff] }
  0x51   :  { %2850 = vmatprep.subr.bf16.mxu1 %v3318_v0  ;;  %v3496_v42 = vpack.c.bf16 %v259_v40, %v258_v39  ;;  %v3499_v44 = vpack.c.bf16 %v261_v43, %v260_v41  ;;  %v262_v45 = vld [vmem:[#allocation10 + $0x20] sm:$0xff]  ;;  %v263_v46 = vld [vmem:[#allocation10 + $0x28] sm:$0xff]  ;;  %v264_v48 = vld [vmem:[#allocation10 + $0x30] sm:$0xff] }
  0x52   :  { %v3503_v47 = vpack.c.bf16 %v263_v46, %v262_v45  ;;  %v265_v49 = vld [vmem:[#allocation10 + $0x38] sm:$0xff]  ;;  %v3525_v56 = vld [vmem:[%s4068_s6] ss:$0 sm:$0xff] }
  0x53   :  { %2838 = vmatpush3.bf16.msra.mxu0 %v2835_v8  ;;  %v3508_v51 = vpack.c.bf16 %v265_v49, %v264_v48  ;;  %v3534_v3 = vld [vmem:[%s4063_s1] sm:$0xff] }
  0x54   :  { %2840 = vmatprep.subr.bf16.mxu0 %v2839_v16  ;;  %2852 = vmatpush3.bf16.msra.mxu1 %v3469_v17  ;;  %vm267_vm3 = vcmp.gt.s32.totalorder %v3534_v3, 0  ;;  %vm500_vm6 = vcmp.gt.s32.totalorder %v3534_v3, 1  ;;  %vm733_vm8 = vcmp.gt.s32.totalorder %v3534_v3, 2  ;;  %vm966_vm10 = vcmp.gt.s32.totalorder %v3534_v3, 3 }
  0x55   :  { %2853 = vmatprep.subr.bf16.mxu1 %v3318_v0  ;;  %v488_v7 = vsel %vm267_vm3, 1, %v3323_v60  ;;  %vm1199_vm12 = vcmp.gt.s32.totalorder %v3534_v3, 4  ;;  %vm1432_vm14 = vcmp.gt.s32.totalorder %v3534_v3, 5 }
  0x57   :  { %2842 = vmatpush3.bf16.msra.mxu0 %v2839_v16  ;;  %2580 = vmatmul.mubr.f32.vlgmr.msra.gmra.mrb[0].mxu1 %v3320_v1 }
  0x58   :  { %2844 = vmatprep.subr.bf16.mxu0 %v2843_v20  ;;  %2598 = vmatprep.mubr.msk.f32.mxu1 %vm3319_vm0, %v3320_v1 }
  0x59   :  { %2855 = vmatpush3.bf16.msra.mxu1 %v3496_v42 }
  0x5a   :  { %2856 = vmatprep.subr.bf16.mxu1 %v3318_v0 }
  0x5b   :  { %2846 = vmatpush3.bf16.msra.mxu0 %v2843_v20 }
  0x5c   :  { %2883 = vmatprep.subr.bf16.mxu0 %v3318_v0 }
  0x5d   :  { %2858 = vmatpush3.bf16.msra.mxu1 %v3499_v44 }
  0x5e   :  { %2560 = vmatmul.mubr.msk.f32.vlgmr.msra.gmra.mrb[0].mxu0 %vm115_vm1, %v93_v21  ;;  %2859 = vmatprep.subr.bf16.mxu1 %v3318_v0 }
  0x5f   :  { %2885 = vmatpush3.bf16.msra.mxu0 %v3465_v12 }
  0x60   :  { %2886 = vmatprep.subr.bf16.mxu0 %v3318_v0 }
  0x61   :  { %2861 = vmatpush3.bf16.msra.mxu1 %v3503_v47 }
  0x62   :  { %2862 = vmatprep.subr.bf16.mxu1 %v3318_v0 }
  0x63   :  { %2888 = vmatpush3.bf16.msra.mxu0 %v3469_v17 }
  0x64   :  { %2889 = vmatprep.subr.bf16.mxu0 %v3318_v0 }
  0x65   :  { %2864 = vmatpush3.bf16.msra.mxu1 %v3508_v51 }
  0x66   :  { %2865 = vmatprep.subr.bf16.mxu1 %v3318_v0 }
 0x12a   :  { %v339_v22 = vpop.f32.mrb[0].mxu1 }
 0x12b   :  { %v2581_v23 = vpop.f32.mrb[1].mxu1 }
 0x131   :  { %v3488_v25 = vpop.f32.mrb[0].mxu0 }
 0x132   :  { %v206_v26 = vpop.f32.mrb[1].mxu0  ;;  %v212_v23 = vadd.f32 %v3488_v25, %v3486_v24 }
 0x133   :  { %v207_v27 = vadd.f32 %v3486_v24, %v206_v26 }
 0x135   :  { %v343_v28 = vadd.f32 %v339_v22, %v207_v27 }
 0x137   :  { %3017 = vtanh.f32 %v343_v28  ;;  %v2362_v30 = vmul.f32 -1.442695, %v343_v28 }
 0x139   :  { %3019 = vpow2.f32 %v2362_v30 }
 0x141   :  { %v3018_v29 = vpop.eup %3017 }
 0x142   :  { %353 = vrot.lane.b32.xlu0 %v3018_v29, %s3321_s12 }
 0x143   :  { %v3020_v31 = vpop.eup %3019 }
 0x144   :  { %v347_v32 = vadd.f32 1.0, %v3020_v31 }
 0x146   :  { %3021 = vrcp.f32 %v347_v32 }
 0x150   :  { %v3022_v33 = vpop.eup %3021 }
 0x151   :  { %v351_v36 = vmul.f32 0.0, %v3022_v33 }
 0x1b4   :  { %v354_v34 = vpop.permute.xlu0 %353 }
 0x1b5   :  { %v356_v35 = vmul.f32 %v3022_v33, %v354_v34 }
 0x1b7   :  { %358 = vrot.lane.b32.xlu0 %v356_v35, %s3322_s13 }
 0x229   :  { %v359_v37 = vpop.permute.xlu0 %358 }
 0x22a   :  { %v3493_v38 = vadd.f32 %v359_v37, %v351_v36 }
 0x22c   :  { %3023 = vtanh.f32 %v3493_v38 }
 0x236   :  { %v3024_v50 = vpop.eup %3023 }
 0x237   :  { %364 = vrot.lane.b32.xlu1 %v3024_v50, %s3321_s12 }
 0x2a9   :  { %v365_v52 = vpop.permute.xlu1 %364 }
 0x2aa   :  { %v367_v53 = vmul.f32 %v3022_v33, %v365_v52 }
 0x2ac   :  { %369 = vrot.lane.b32.xlu1 %v367_v53, %s3322_s13 }
 0x31e   :  { %v370_v54 = vpop.permute.xlu1 %369 }
 0x31f   :  { %v372_v55 = vsel %vm269_vm2, %v370_v54, 0.0  ;;  %v484_v16 = vsel %vm269_vm2, %v370_v54, %v3493_v38 }
 0x320   :  { %2599 = vmatmul.mubr.msk.f32.vlgmr.msra.gmra.mrb[2].mxu1 %vm115_vm1, %v372_v55 }
 0x321   :  { %2867 = vmatpush3.bf16.msra.mxu1 %v3465_v12  ;;  %2609 = vmatprep.mubr.msk.f32.mxu1 %vm3319_vm0, %v3320_v1 }
 0x322   :  { %2868 = vmatprep.subr.bf16.mxu1 %v3318_v0 }
 0x325   :  { %2870 = vmatpush3.bf16.msra.mxu1 %v3469_v17 }
 0x326   :  { %2871 = vmatprep.subr.bf16.mxu1 %v3318_v0 }
 0x3f3   :  { %v448_v57 = vpop.f32.mrb[2].mxu1 }
 0x3f4   :  { %v449_v58 = vadd.f32 %v3525_v56, %v448_v57  ;;  %v2600_v59 = vpop.f32.mrb[3].mxu1 }
 0x3f5   :  { %v720_v59 = vsel %vm500_vm6, 1, %v3323_v60 }
 0x3f6   :  { %3025 = vtanh.f32 %v449_v58  ;;  %v2365_v62 = vmul.f32 -1.442695, %v449_v58 }
 0x3f8   :  { %3027 = vpow2.f32 %v2365_v62 }
 0x400   :  { %v3026_v61 = vpop.eup %3025 }
 0x401   :  { %461 = vrot.lane.b32.xlu0 %v3026_v61, %s3321_s12 }
 0x402   :  { %v3028_v63 = vpop.eup %3027 }
 0x403   :  { %v455_v2 = vadd.f32 1.0, %v3028_v63 }
 0x405   :  { %3029 = vrcp.f32 %v455_v2 }
 0x40f   :  { %v3030_v4 = vpop.eup %3029 }
 0x410   :  { %v459_v8 = vmul.f32 0.0, %v3030_v4 }
 0x473   :  { %v462_v5 = vpop.permute.xlu0 %461 }
 0x474   :  { %v464_v6 = vmul.f32 %v3030_v4, %v462_v5  ;;  %v95_v5 = vld [vmem:[#allocation4 + $0x18] sm:$0xff] }
 0x476   :  { %466 = vrot.lane.b32.xlu1 %v464_v6, %s3322_s13  ;;  %v96_v6 = vld [vmem:[#allocation4 + $0x20] sm:$0xff] }
 0x47a   :  { %490 = vperm.xlu1 %3015, %v488_v7   ;;  %v97_v7 = vld [vmem:[#allocation4 + $0x28] sm:$0xff] }
 0x4e8   :  { %v467_v9 = vpop.permute.xlu1 %466 }
 0x4e9   :  { %v469_v10 = vadd.f32 %v467_v9, %v459_v8  ;;  %v98_v8 = vld [vmem:[#allocation4 + $0x30] sm:$0xff]  ;;  %v99_v9 = vld [vmem:[#allocation4 + $0x38] sm:$0xff] }
 0x4eb   :  { %3031 = vtanh.f32 %v469_v10  ;;  %481 = vrot.lane.b32.xlu1 %v469_v10, %s3321_s12 }
 0x4f5   :  { %v3032_v11 = vpop.eup %3031 }
 0x4f6   :  { %472 = vrot.lane.b32.xlu0 %v3032_v11, %s3321_s12 }
 0x4f9   :  { %v3545_v15 = vpop.permute.xlu1 %490 }
 0x4fa   :  { %vm492_vm5 = vcmp.eq.s32.totalorder %v3545_v15, 1 }
 0x55d   :  { %v482_v19 = vpop.permute.xlu1 %481 }
 0x568   :  { %v473_v13 = vpop.permute.xlu0 %472 }
 0x569   :  { %v3541_v14 = vmul.f32 %v3030_v4, %v473_v13  ;;  %v94_v4 = vld [vmem:[#allocation4 + $0x10] sm:$0xff] }
 0x56a   :  { %2562 = vmatprep.mubr.msk.f32.mxu0 %vm115_vm1, %v94_v4 }
 0x56b   :  { %477 = vrot.lane.b32.xlu0 %v3541_v14, %s3324_s0  ;;  %2563 = vmatmul.mubr.msk.f32.gmra.mrb[2].mxu0 %vm115_vm1, %v95_v5 }
 0x56c   :  { %2565 = vmatprep.mubr.msk.f32.mxu0 %vm115_vm1, %v96_v6  ;;  %v953_v6 = vsel %vm733_vm8, 1, %v3323_v60 }
 0x56f   :  { %2566 = vmatmul.mubr.msk.f32.gmra.mrb[4].mxu0 %vm115_vm1, %v97_v7 }
 0x570   :  { %2568 = vmatprep.mubr.msk.f32.mxu0 %vm115_vm1, %v98_v8 }
 0x573   :  { %2569 = vmatmul.mubr.msk.f32.gmra.mrb[6].mxu0 %vm115_vm1, %v99_v9 }
 0x574   :  { %2639 = vmatprep.mubr.msk.f32.mxu0 %vm3319_vm0, %v3320_v1 }
 0x5dd   :  { %v478_v18 = vpop.permute.xlu0 %477 }
 0x5de   :  { %v485_v20 = vsel %vm115_vm1, %v484_v16, %v478_v18 }
 0x5df   :  { %v487_v21 = vsel %vm486_vm4, %v485_v20, %v482_v19 }
 0x5e0   :  { %v3554_v22 = vsel %vm492_vm5, %v487_v21, 0.0 }
 0x5e1   :  { %2610 = vmatmul.mubr.msk.f32.vlgmr.msra.gmra.mrb[4].mxu1 %vm269_vm2, %v3554_v22 }
 0x5e2   :  { %2873 = vmatpush3.bf16.msra.mxu1 %v3496_v42  ;;  %2628 = vmatprep.mubr.msk.f32.mxu1 %vm3319_vm0, %v3320_v1 }
 0x5e3   :  { %2874 = vmatprep.subr.bf16.mxu1 %v3318_v0 }
 0x5e6   :  { %2876 = vmatpush3.bf16.msra.mxu1 %v3499_v44 }
 0x5e7   :  { %2877 = vmatprep.subr.bf16.mxu1 %v3318_v0 }
 0x5ea   :  { %2879 = vmatpush3.bf16.msra.mxu1 %v3503_v47 }
 0x5eb   :  { %2880 = vmatprep.subr.bf16.mxu1 %v3318_v0 }
 0x5ee   :  { %2882 = vmatpush3.bf16.msra.mxu1 %v3508_v51 }
 0x5ef   :  { %2901 = vmatprep.subr.bf16.mxu1 %v3318_v0 }
 0x63e   :  { %v3609_v16 = vpop.f32.mrb[2].mxu0 }
 0x63f   :  { %v216_v18 = vpop.f32.mrb[3].mxu0 }
 0x642   :  { %v3611_v19 = vpop.f32.mrb[4].mxu0 }
 0x643   :  { %v3613_v20 = vpop.f32.mrb[5].mxu0 }
 0x646   :  { %v3615_v21 = vpop.f32.mrb[6].mxu0 }
 0x6b4   :  { %v572_v26 = vpop.f32.mrb[4].mxu1 }
 0x6b5   :  { %v576_v27 = vadd.f32 %v572_v26, %v212_v23  ;;  %v2611_v28 = vpop.f32.mrb[5].mxu1  ;;  %v3617_v23 = vpop.f32.mrb[7].mxu0 }
 0x6b7   :  { %3033 = vtanh.f32 %v576_v27  ;;  %v2367_v30 = vmul.f32 -1.442695, %v576_v27 }
 0x6b9   :  { %3035 = vpow2.f32 %v2367_v30 }
 0x6c1   :  { %v3034_v29 = vpop.eup %3033 }
 0x6c2   :  { %586 = vrot.lane.b32.xlu0 %v3034_v29, %s3321_s12 }
 0x6c3   :  { %v3036_v31 = vpop.eup %3035 }
 0x6c4   :  { %v580_v32 = vadd.f32 1.0, %v3036_v31 }
 0x6c6   :  { %3037 = vrcp.f32 %v580_v32 }
 0x6d0   :  { %v3038_v33 = vpop.eup %3037 }
 0x6d1   :  { %v584_v36 = vmul.f32 %v3038_v33, %v3554_v22 }
 0x734   :  { %v587_v34 = vpop.permute.xlu0 %586 }
 0x735   :  { %v589_v35 = vmul.f32 %v3038_v33, %v587_v34 }
 0x737   :  { %591 = vrot.lane.b32.xlu1 %v589_v35, %s3322_s13 }
 0x7a9   :  { %v592_v25 = vpop.permute.xlu1 %591 }
 0x7aa   :  { %v3573_v37 = vadd.f32 %v592_v25, %v584_v36 }
 0x7ac   :  { %3039 = vtanh.f32 %v3573_v37 }
 0x7b6   :  { %v3040_v38 = vpop.eup %3039 }
 0x7b7   :  { %597 = vrot.lane.b32.xlu0 %v3040_v38, %s3321_s12 }
 0x7bb   :  { %605 = vrot.lane.b32.xlu0 %v3554_v22, %s3324_s0 }
 0x7bf   :  { %689 = vrot.lane.b32.xlu0 %v3554_v22, %s3321_s12 }
 0x829   :  { %v598_v39 = vpop.permute.xlu0 %597 }
 0x82a   :  { %v600_v40 = vmul.f32 %v3038_v33, %v598_v39 }
 0x82c   :  { %602 = vrot.lane.b32.xlu1 %v600_v40, %s3322_s13 }
 0x82d   :  { %v606_v41 = vpop.permute.xlu0 %605 }
 0x831   :  { %v690_v61 = vpop.permute.xlu0 %689 }
 0x89e   :  { %v603_v43 = vpop.permute.xlu1 %602 }
 0x89f   :  { %v608_v45 = vsel %vm269_vm2, %v603_v43, %v606_v41  ;;  %v717_v27 = vsel %vm269_vm2, %v603_v43, %v3573_v37 }
 0x8a0   :  { %2629 = vmatmul.mubr.msk.f32.vlgmr.msra.gmra.mrb[6].mxu1 %vm115_vm1, %v608_v45 }
 0x8a1   :  { %2903 = vmatpush3.bf16.msra.mxu1 %v3465_v12  ;;  %2669 = vmatprep.mubr.msk.f32.mxu1 %vm3319_vm0, %v3320_v1 }
 0x8a2   :  { %2904 = vmatprep.subr.bf16.mxu1 %v3318_v0 }
 0x8a5   :  { %2906 = vmatpush3.bf16.msra.mxu1 %v3469_v17 }
 0x8a6   :  { %2907 = vmatprep.subr.bf16.mxu1 %v3318_v0 }
 0x973   :  { %v678_v46 = vpop.f32.mrb[6].mxu1 }
 0x974   :  { %v679_v48 = vadd.f32 %v3525_v56, %v678_v46  ;;  %v2630_v49 = vpop.f32.mrb[7].mxu1 }
 0x976   :  { %3041 = vtanh.f32 %v679_v48  ;;  %v2369_v52 = vmul.f32 -1.442695, %v679_v48 }
 0x978   :  { %3043 = vpow2.f32 %v2369_v52 }
 0x980   :  { %v3042_v50 = vpop.eup %3041 }
 0x981   :  { %694 = vrot.lane.b32.xlu1 %v3042_v50, %s3321_s12 }
 0x982   :  { %v3044_v53 = vpop.eup %3043 }
 0x983   :  { %v685_v54 = vadd.f32 1.0, %v3044_v53 }
 0x985   :  { %3045 = vrcp.f32 %v685_v54 }
 0x98f   :  { %v3046_v55 = vpop.eup %3045 }
 0x990   :  { %v692_v62 = vmul.f32 %v3046_v55, %v690_v61 }
 0x9f3   :  { %v695_v57 = vpop.permute.xlu1 %694 }
 0x9f4   :  { %v697_v58 = vmul.f32 %v3046_v55, %v695_v57 }
 0x9f6   :  { %699 = vrot.lane.b32.xlu1 %v697_v58, %s3322_s13 }
 0x9fa   :  { %722 = vperm.xlu1 %3015, %v720_v59  }
 0xa68   :  { %v700_v63 = vpop.permute.xlu1 %699 }
 0xa69   :  { %v702_v2 = vadd.f32 %v700_v63, %v692_v62 }
 0xa6b   :  { %3047 = vtanh.f32 %v702_v2  ;;  %714 = vrot.lane.b32.xlu1 %v702_v2, %s3321_s12 }
 0xa75   :  { %v3048_v10 = vpop.eup %3047 }
 0xa76   :  { %705 = vrot.lane.b32.xlu0 %v3048_v10, %s3321_s12 }
 0xa79   :  { %v3619_v26 = vpop.permute.xlu1 %722 }
 0xa7a   :  { %vm724_vm7 = vcmp.eq.s32.totalorder %v3619_v26, 1 }
 0xadd   :  { %v715_v29 = vpop.permute.xlu1 %714 }
 0xae8   :  { %v706_v11 = vpop.permute.xlu0 %705 }
 0xae9   :  { %v3605_v13 = vmul.f32 %v3046_v55, %v706_v11 }
 0xaeb   :  { %710 = vrot.lane.b32.xlu0 %v3605_v13, %s3324_s0 }
 0xb5d   :  { %v711_v28 = vpop.permute.xlu0 %710 }
 0xb5e   :  { %v718_v30 = vsel %vm115_vm1, %v717_v27, %v711_v28 }
 0xb5f   :  { %v719_v31 = vsel %vm486_vm4, %v718_v30, %v715_v29 }
 0xb60   :  { %v3629_v32 = vsel %vm724_vm7, %v719_v31, %v3554_v22  ;;  %v217_v22 = vadd.f32 %v3486_v24, %v216_v18 }
 0xb61   :  { %2640 = vmatmul.mubr.msk.f32.vlgmr.msra.gmra.mrb[8].mxu0 %vm269_vm2, %v3629_v32 }
 0xb62   :  { %2891 = vmatpush3.bf16.msra.mxu0 %v3496_v42  ;;  %2658 = vmatprep.mubr.msk.f32.mxu0 %vm3319_vm0, %v3320_v1 }
 0xb63   :  { %2892 = vmatprep.subr.bf16.mxu0 %v3318_v0 }
 0xb66   :  { %2894 = vmatpush3.bf16.msra.mxu0 %v3499_v44 }
 0xb67   :  { %2895 = vmatprep.subr.bf16.mxu0 %v3318_v0 }
 0xb6a   :  { %2897 = vmatpush3.bf16.msra.mxu0 %v3503_v47 }
 0xb6b   :  { %2898 = vmatprep.subr.bf16.mxu0 %v3318_v0 }
 0xb6e   :  { %2900 = vmatpush3.bf16.msra.mxu0 %v3508_v51 }
 0xb6f   :  { %2919 = vmatprep.subr.bf16.mxu0 %v3318_v0 }
 0xc34   :  { %v805_v33 = vpop.f32.mrb[8].mxu0 }
 0xc35   :  { %v809_v34 = vadd.f32 %v805_v33, %v217_v22  ;;  %v2641_v35 = vpop.f32.mrb[9].mxu0 }
 0xc37   :  { %3049 = vtanh.f32 %v809_v34  ;;  %v2371_v25 = vmul.f32 -1.442695, %v809_v34 }
 0xc39   :  { %3051 = vpow2.f32 %v2371_v25 }
 0xc41   :  { %v3050_v36 = vpop.eup %3049 }
 0xc42   :  { %819 = vrot.lane.b32.xlu0 %v3050_v36, %s3321_s12 }
 0xc43   :  { %v3052_v37 = vpop.eup %3051 }
 0xc44   :  { %v813_v38 = vadd.f32 1.0, %v3052_v37 }
 0xc46   :  { %3053 = vrcp.f32 %v813_v38 }
 0xc50   :  { %v3054_v39 = vpop.eup %3053 }
 0xc51   :  { %v817_v43 = vmul.f32 %v3054_v39, %v3629_v32 }
 0xcb4   :  { %v820_v40 = vpop.permute.xlu0 %819 }
 0xcb5   :  { %v822_v41 = vmul.f32 %v3054_v39, %v820_v40 }
 0xcb7   :  { %824 = vrot.lane.b32.xlu1 %v822_v41, %s3322_s13 }
 0xd29   :  { %v825_v45 = vpop.permute.xlu1 %824 }
 0xd2a   :  { %v827_v46 = vadd.f32 %v825_v45, %v817_v43 }
 0xd2c   :  { %3055 = vtanh.f32 %v827_v46 }
 0xd36   :  { %v3056_v48 = vpop.eup %3055 }
 0xd37   :  { %830 = vrot.lane.b32.xlu0 %v3056_v48, %s3321_s12 }
 0xd3b   :  { %838 = vrot.lane.b32.xlu0 %v3629_v32, %s3324_s0 }
 0xd3f   :  { %922 = vrot.lane.b32.xlu0 %v3629_v32, %s3321_s12 }
 0xda9   :  { %v831_v49 = vpop.permute.xlu0 %830 }
 0xdaa   :  { %v833_v50 = vmul.f32 %v3054_v39, %v831_v49 }
 0xdac   :  { %835 = vrot.lane.b32.xlu1 %v833_v50, %s3322_s13 }
 0xdad   :  { %v839_v52 = vpop.permute.xlu0 %838 }
 0xdb1   :  { %v923_v7 = vpop.permute.xlu0 %922 }
 0xe1e   :  { %v836_v53 = vpop.permute.xlu1 %835 }
 0xe1f   :  { %v841_v54 = vsel %vm269_vm2, %v836_v53, %v839_v52  ;;  %v950_v29 = vsel %vm269_vm2, %v836_v53, %v827_v46 }
 0xe20   :  { %2659 = vmatmul.mubr.msk.f32.vlgmr.msra.gmra.mrb[10].mxu0 %vm115_vm1, %v841_v54 }
 0xe21   :  { %2921 = vmatpush3.bf16.msra.mxu0 %v3465_v12  ;;  %2699 = vmatprep.mubr.msk.f32.mxu0 %vm3319_vm0, %v3320_v1 }
 0xe22   :  { %2922 = vmatprep.subr.bf16.mxu0 %v3318_v0 }
 0xe25   :  { %2924 = vmatpush3.bf16.msra.mxu0 %v3469_v17 }
 0xe26   :  { %2925 = vmatprep.subr.bf16.mxu0 %v3318_v0 }
 0xef3   :  { %v911_v55 = vpop.f32.mrb[10].mxu0 }
 0xef4   :  { %v912_v57 = vadd.f32 %v3525_v56, %v911_v55  ;;  %v2660_v58 = vpop.f32.mrb[11].mxu0 }
 0xef6   :  { %3057 = vtanh.f32 %v912_v57  ;;  %v2373_v61 = vmul.f32 -1.442695, %v912_v57 }
 0xef8   :  { %3059 = vpow2.f32 %v2373_v61 }
 0xf00   :  { %v3058_v59 = vpop.eup %3057 }
 0xf01   :  { %927 = vrot.lane.b32.xlu1 %v3058_v59, %s3321_s12 }
 0xf02   :  { %v3060_v62 = vpop.eup %3059 }
 0xf03   :  { %v918_v63 = vadd.f32 1.0, %v3060_v62 }
 0xf05   :  { %3061 = vrcp.f32 %v918_v63 }
 0xf0f   :  { %v3062_v2 = vpop.eup %3061 }
 0xf10   :  { %v925_v8 = vmul.f32 %v3062_v2, %v923_v7  ;;  %v1186_v7 = vsel %vm966_vm10, 1, %v3323_v60 }
 0xf73   :  { %v928_v4 = vpop.permute.xlu1 %927 }
 0xf74   :  { %v930_v5 = vmul.f32 %v3062_v2, %v928_v4 }
 0xf76   :  { %932 = vrot.lane.b32.xlu1 %v930_v5, %s3322_s13 }
 0xf7a   :  { %955 = vperm.xlu1 %3015, %v953_v6  }
 0xfe8   :  { %v933_v9 = vpop.permute.xlu1 %932 }
 0xfe9   :  { %v935_v10 = vadd.f32 %v933_v9, %v925_v8 }
 0xfeb   :  { %3063 = vtanh.f32 %v935_v10  ;;  %947 = vrot.lane.b32.xlu1 %v935_v10, %s3321_s12 }
 0xff5   :  { %v3064_v11 = vpop.eup %3063 }
 0xff6   :  { %938 = vrot.lane.b32.xlu0 %v3064_v11, %s3321_s12 }
 0xff9   :  { %v3672_v28 = vpop.permute.xlu1 %955 }
 0xffa   :  { %vm957_vm9 = vcmp.eq.s32.totalorder %v3672_v28, 1 }
0x105d   :  { %v948_v31 = vpop.permute.xlu1 %947 }
0x1068   :  { %v939_v18 = vpop.permute.xlu0 %938 }
0x1069   :  { %v3668_v27 = vmul.f32 %v3062_v2, %v939_v18 }
0x106b   :  { %943 = vrot.lane.b32.xlu0 %v3668_v27, %s3324_s0 }
0x10dd   :  { %v944_v30 = vpop.permute.xlu0 %943 }
0x10de   :  { %v951_v22 = vsel %vm115_vm1, %v950_v29, %v944_v30 }
0x10df   :  { %v952_v33 = vsel %vm486_vm4, %v951_v22, %v948_v31 }
0x10e0   :  { %v3681_v34 = vsel %vm957_vm9, %v952_v33, %v3629_v32  ;;  %v222_v32 = vadd.f32 %v3609_v16, %v3486_v24 }
0x10e1   :  { %2670 = vmatmul.mubr.msk.f32.vlgmr.msra.gmra.mrb[8].mxu1 %vm269_vm2, %v3681_v34 }
0x10e2   :  { %2909 = vmatpush3.bf16.msra.mxu1 %v3496_v42  ;;  %2688 = vmatprep.mubr.msk.f32.mxu1 %vm3319_vm0, %v3320_v1 }
0x10e3   :  { %2910 = vmatprep.subr.bf16.mxu1 %v3318_v0 }
0x10e6   :  { %2912 = vmatpush3.bf16.msra.mxu1 %v3499_v44 }
0x10e7   :  { %2913 = vmatprep.subr.bf16.mxu1 %v3318_v0 }
0x10ea   :  { %2915 = vmatpush3.bf16.msra.mxu1 %v3503_v47 }
0x10eb   :  { %2916 = vmatprep.subr.bf16.mxu1 %v3318_v0 }
0x10ee   :  { %2918 = vmatpush3.bf16.msra.mxu1 %v3508_v51 }
0x10ef   :  { %2937 = vmatprep.subr.bf16.mxu1 %v3318_v0 }
0x11b4   :  { %v1038_v35 = vpop.f32.mrb[8].mxu1 }
0x11b5   :  { %v1042_v36 = vadd.f32 %v1038_v35, %v222_v32  ;;  %v2671_v25 = vpop.f32.mrb[9].mxu1 }
0x11b7   :  { %3065 = vtanh.f32 %v1042_v36  ;;  %v2375_v38 = vmul.f32 -1.442695, %v1042_v36 }
0x11b9   :  { %3067 = vpow2.f32 %v2375_v38 }
0x11c1   :  { %v3066_v37 = vpop.eup %3065 }
0x11c2   :  { %1052 = vrot.lane.b32.xlu0 %v3066_v37, %s3321_s12 }
0x11c3   :  { %v3068_v39 = vpop.eup %3067 }
0x11c4   :  { %v1046_v40 = vadd.f32 1.0, %v3068_v39 }
0x11c6   :  { %3069 = vrcp.f32 %v1046_v40 }
0x11d0   :  { %v3070_v41 = vpop.eup %3069 }
0x11d1   :  { %v1050_v46 = vmul.f32 %v3070_v41, %v3681_v34 }
0x1234   :  { %v1053_v43 = vpop.permute.xlu0 %1052 }
0x1235   :  { %v1055_v45 = vmul.f32 %v3070_v41, %v1053_v43 }
0x1237   :  { %1057 = vrot.lane.b32.xlu1 %v1055_v45, %s3322_s13 }
0x12a9   :  { %v1058_v16 = vpop.permute.xlu1 %1057 }
0x12aa   :  { %v1060_v48 = vadd.f32 %v1058_v16, %v1050_v46 }
0x12ac   :  { %3071 = vtanh.f32 %v1060_v48 }
0x12b6   :  { %v3072_v49 = vpop.eup %3071 }
0x12b7   :  { %1063 = vrot.lane.b32.xlu0 %v3072_v49, %s3321_s12 }
0x12bb   :  { %1071 = vrot.lane.b32.xlu0 %v3681_v34, %s3324_s0 }
0x12bf   :  { %1155 = vrot.lane.b32.xlu0 %v3681_v34, %s3321_s12 }
0x1329   :  { %v1064_v50 = vpop.permute.xlu0 %1063 }
0x132a   :  { %v1066_v52 = vmul.f32 %v3070_v41, %v1064_v50 }
0x132c   :  { %1068 = vrot.lane.b32.xlu1 %v1066_v52, %s3322_s13 }
0x132d   :  { %v1072_v53 = vpop.permute.xlu0 %1071 }
0x1331   :  { %v1156_v8 = vpop.permute.xlu0 %1155 }
0x139e   :  { %v1069_v54 = vpop.permute.xlu1 %1068 }
0x139f   :  { %v1074_v55 = vsel %vm269_vm2, %v1069_v54, %v1072_v53  ;;  %v1183_v22 = vsel %vm269_vm2, %v1069_v54, %v1060_v48 }
0x13a0   :  { %2689 = vmatmul.mubr.msk.f32.vlgmr.msra.gmra.mrb[10].mxu1 %vm115_vm1, %v1074_v55 }
0x13a1   :  { %2939 = vmatpush3.bf16.msra.mxu1 %v3465_v12  ;;  %2729 = vmatprep.mubr.msk.f32.mxu1 %vm3319_vm0, %v3320_v1 }
0x13a2   :  { %2940 = vmatprep.subr.bf16.mxu1 %v3318_v0 }
0x13a5   :  { %2942 = vmatpush3.bf16.msra.mxu1 %v3469_v17 }
0x13a6   :  { %2943 = vmatprep.subr.bf16.mxu1 %v3318_v0 }
0x1473   :  { %v1144_v57 = vpop.f32.mrb[10].mxu1 }
0x1474   :  { %v1145_v58 = vadd.f32 %v3525_v56, %v1144_v57  ;;  %v2690_v59 = vpop.f32.mrb[11].mxu1 }
0x1476   :  { %3073 = vtanh.f32 %v1145_v58  ;;  %v2377_v62 = vmul.f32 -1.442695, %v1145_v58 }
0x1478   :  { %3075 = vpow2.f32 %v2377_v62 }
0x1480   :  { %v3074_v61 = vpop.eup %3073 }
0x1481   :  { %1160 = vrot.lane.b32.xlu1 %v3074_v61, %s3321_s12 }
0x1482   :  { %v3076_v63 = vpop.eup %3075 }
0x1483   :  { %v1151_v2 = vadd.f32 1.0, %v3076_v63 }
0x1485   :  { %3077 = vrcp.f32 %v1151_v2 }
0x148f   :  { %v3078_v4 = vpop.eup %3077 }
0x1490   :  { %v1158_v9 = vmul.f32 %v3078_v4, %v1156_v8 }
0x14f3   :  { %v1161_v5 = vpop.permute.xlu1 %1160 }
0x14f4   :  { %v1163_v6 = vmul.f32 %v3078_v4, %v1161_v5 }
0x14f6   :  { %1165 = vrot.lane.b32.xlu1 %v1163_v6, %s3322_s13 }
0x14fa   :  { %1188 = vperm.xlu1 %3015, %v1186_v7  }
0x1568   :  { %v1166_v10 = vpop.permute.xlu1 %1165 }
0x1569   :  { %v1168_v11 = vadd.f32 %v1166_v10, %v1158_v9  ;;  %v1419_v9 = vsel %vm1199_vm12, 1, %v3323_v60 }
0x156b   :  { %3079 = vtanh.f32 %v1168_v11  ;;  %1180 = vrot.lane.b32.xlu1 %v1168_v11, %s3321_s12 }
0x1575   :  { %v3080_v18 = vpop.eup %3079 }
0x1576   :  { %1171 = vrot.lane.b32.xlu0 %v3080_v18, %s3321_s12 }
0x1579   :  { %v3725_v31 = vpop.permute.xlu1 %1188 }
0x157a   :  { %vm1190_vm11 = vcmp.eq.s32.totalorder %v3725_v31, 1 }
0x15dd   :  { %v1181_v32 = vpop.permute.xlu1 %1180 }
0x15e8   :  { %v1172_v29 = vpop.permute.xlu0 %1171 }
0x15e9   :  { %v3721_v30 = vmul.f32 %v3078_v4, %v1172_v29 }
0x15eb   :  { %1176 = vrot.lane.b32.xlu0 %v3721_v30, %s3324_s0 }
0x165d   :  { %v1177_v33 = vpop.permute.xlu0 %1176 }
0x165e   :  { %v1184_v35 = vsel %vm115_vm1, %v1183_v22, %v1177_v33 }
0x165f   :  { %v1185_v36 = vsel %vm486_vm4, %v1184_v35, %v1181_v32 }
0x1660   :  { %v3734_v25 = vsel %vm1190_vm11, %v1185_v36, %v3681_v34  ;;  %v227_v34 = vadd.f32 %v3486_v24, %v3613_v20 }
0x1661   :  { %2700 = vmatmul.mubr.msk.f32.vlgmr.msra.gmra.mrb[12].mxu0 %vm269_vm2, %v3734_v25 }
0x1662   :  { %2927 = vmatpush3.bf16.msra.mxu0 %v3496_v42  ;;  %2718 = vmatprep.mubr.msk.f32.mxu0 %vm3319_vm0, %v3320_v1 }
0x1663   :  { %2928 = vmatprep.subr.bf16.mxu0 %v3318_v0 }
0x1666   :  { %2930 = vmatpush3.bf16.msra.mxu0 %v3499_v44 }
0x1667   :  { %2931 = vmatprep.subr.bf16.mxu0 %v3318_v0 }
0x166a   :  { %2933 = vmatpush3.bf16.msra.mxu0 %v3503_v47 }
0x166b   :  { %2934 = vmatprep.subr.bf16.mxu0 %v3318_v0 }
0x166e   :  { %2936 = vmatpush3.bf16.msra.mxu0 %v3508_v51 }
0x166f   :  { %2955 = vmatprep.subr.bf16.mxu0 %v3318_v0 }
0x1734   :  { %v1271_v37 = vpop.f32.mrb[12].mxu0 }
0x1735   :  { %v1275_v38 = vadd.f32 %v1271_v37, %v227_v34  ;;  %v2701_v39 = vpop.f32.mrb[13].mxu0 }
0x1737   :  { %3081 = vtanh.f32 %v1275_v38  ;;  %v2379_v41 = vmul.f32 -1.442695, %v1275_v38 }
0x1739   :  { %3083 = vpow2.f32 %v2379_v41 }
0x1741   :  { %v3082_v40 = vpop.eup %3081 }
0x1742   :  { %1285 = vrot.lane.b32.xlu0 %v3082_v40, %s3321_s12 }
0x1743   :  { %v3084_v43 = vpop.eup %3083 }
0x1744   :  { %v1279_v45 = vadd.f32 1.0, %v3084_v43 }
0x1746   :  { %3085 = vrcp.f32 %v1279_v45 }
0x1750   :  { %v3086_v46 = vpop.eup %3085 }
0x1751   :  { %v1283_v49 = vmul.f32 %v3086_v46, %v3734_v25 }
0x17b4   :  { %v1286_v16 = vpop.permute.xlu0 %1285 }
0x17b5   :  { %v1288_v48 = vmul.f32 %v3086_v46, %v1286_v16 }
0x17b7   :  { %1290 = vrot.lane.b32.xlu1 %v1288_v48, %s3322_s13 }
0x1829   :  { %v1291_v20 = vpop.permute.xlu1 %1290 }
0x182a   :  { %v1293_v50 = vadd.f32 %v1291_v20, %v1283_v49 }
0x182c   :  { %3087 = vtanh.f32 %v1293_v50 }
0x1836   :  { %v3088_v52 = vpop.eup %3087 }
0x1837   :  { %1296 = vrot.lane.b32.xlu0 %v3088_v52, %s3321_s12 }
0x183b   :  { %1304 = vrot.lane.b32.xlu0 %v3734_v25, %s3324_s0 }
0x183f   :  { %1388 = vrot.lane.b32.xlu0 %v3734_v25, %s3321_s12 }
0x18a9   :  { %v1297_v53 = vpop.permute.xlu0 %1296 }
0x18aa   :  { %v1299_v54 = vmul.f32 %v3086_v46, %v1297_v53 }
0x18ac   :  { %1301 = vrot.lane.b32.xlu1 %v1299_v54, %s3322_s13 }
0x18ad   :  { %v1305_v55 = vpop.permute.xlu0 %1304 }
0x18b1   :  { %v1389_v10 = vpop.permute.xlu0 %1388 }
0x191e   :  { %v1302_v57 = vpop.permute.xlu1 %1301 }
0x191f   :  { %v1307_v58 = vsel %vm269_vm2, %v1302_v57, %v1305_v55  ;;  %v1416_v36 = vsel %vm269_vm2, %v1302_v57, %v1293_v50 }
0x1920   :  { %2719 = vmatmul.mubr.msk.f32.vlgmr.msra.gmra.mrb[14].mxu0 %vm115_vm1, %v1307_v58 }
0x1921   :  { %2957 = vmatpush3.bf16.msra.mxu0 %v3465_v12  ;;  %2759 = vmatprep.mubr.msk.f32.mxu0 %vm3319_vm0, %v3320_v1 }
0x1922   :  { %2958 = vmatprep.subr.bf16.mxu0 %v3318_v0 }
0x1925   :  { %2960 = vmatpush3.bf16.msra.mxu0 %v3469_v17 }
0x1926   :  { %2961 = vmatprep.subr.bf16.mxu0 %v3318_v0 }
0x19f3   :  { %v1377_v59 = vpop.f32.mrb[14].mxu0 }
0x19f4   :  { %v1378_v61 = vadd.f32 %v3525_v56, %v1377_v59  ;;  %v2720_v62 = vpop.f32.mrb[15].mxu0 }
0x19f6   :  { %3089 = vtanh.f32 %v1378_v61  ;;  %v2381_v2 = vmul.f32 -1.442695, %v1378_v61 }
0x19f8   :  { %3091 = vpow2.f32 %v2381_v2 }
0x1a00   :  { %v3090_v63 = vpop.eup %3089 }
0x1a01   :  { %1393 = vrot.lane.b32.xlu1 %v3090_v63, %s3321_s12 }
0x1a02   :  { %v3092_v4 = vpop.eup %3091 }
0x1a03   :  { %v1384_v5 = vadd.f32 1.0, %v3092_v4 }
0x1a05   :  { %3093 = vrcp.f32 %v1384_v5 }
0x1a0f   :  { %v3094_v6 = vpop.eup %3093 }
0x1a10   :  { %v1391_v11 = vmul.f32 %v3094_v6, %v1389_v10 }
0x1a73   :  { %v1394_v7 = vpop.permute.xlu1 %1393 }
0x1a74   :  { %v1396_v8 = vmul.f32 %v3094_v6, %v1394_v7 }
0x1a76   :  { %1398 = vrot.lane.b32.xlu1 %v1396_v8, %s3322_s13 }
0x1a7a   :  { %1421 = vperm.xlu1 %3015, %v1419_v9  }
0x1ae8   :  { %v1399_v18 = vpop.permute.xlu1 %1398 }
0x1ae9   :  { %v1401_v29 = vadd.f32 %v1399_v18, %v1391_v11 }
0x1aeb   :  { %3095 = vtanh.f32 %v1401_v29  ;;  %1413 = vrot.lane.b32.xlu1 %v1401_v29, %s3321_s12 }
0x1af5   :  { %v3096_v22 = vpop.eup %3095 }
0x1af6   :  { %1404 = vrot.lane.b32.xlu0 %v3096_v22, %s3321_s12 }
0x1af9   :  { %v3778_v35 = vpop.permute.xlu1 %1421 }
0x1afa   :  { %vm1423_vm13 = vcmp.eq.s32.totalorder %v3778_v35, 1 }
0x1b5d   :  { %v1414_v37 = vpop.permute.xlu1 %1413 }
0x1b68   :  { %v1405_v33 = vpop.permute.xlu0 %1404 }
0x1b69   :  { %v3774_v32 = vmul.f32 %v3094_v6, %v1405_v33 }
0x1b6b   :  { %1409 = vrot.lane.b32.xlu0 %v3774_v32, %s3324_s0 }
0x1bdd   :  { %v1410_v34 = vpop.permute.xlu0 %1409 }
0x1bde   :  { %v1417_v38 = vsel %vm115_vm1, %v1416_v36, %v1410_v34 }
0x1bdf   :  { %v1418_v39 = vsel %vm486_vm4, %v1417_v38, %v1414_v37 }
0x1be0   :  { %v3787_v40 = vsel %vm1423_vm13, %v1418_v39, %v3734_v25  ;;  %v232_v25 = vadd.f32 %v3611_v19, %v3486_v24 }
0x1be1   :  { %2730 = vmatmul.mubr.msk.f32.vlgmr.msra.gmra.mrb[12].mxu1 %vm269_vm2, %v3787_v40 }
0x1be2   :  { %2945 = vmatpush3.bf16.msra.mxu1 %v3496_v42  ;;  %2748 = vmatprep.mubr.msk.f32.mxu1 %vm3319_vm0, %v3320_v1 }
0x1be3   :  { %2946 = vmatprep.subr.bf16.mxu1 %v3318_v0 }
0x1be6   :  { %2948 = vmatpush3.bf16.msra.mxu1 %v3499_v44 }
0x1be7   :  { %2949 = vmatprep.subr.bf16.mxu1 %v3318_v0 }
0x1bea   :  { %2951 = vmatpush3.bf16.msra.mxu1 %v3503_v47 }
0x1beb   :  { %2952 = vmatprep.subr.bf16.mxu1 %v3318_v0 }
0x1bee   :  { %2954 = vmatpush3.bf16.msra.mxu1 %v3508_v51 }
0x1bef   :  { %2973 = vmatprep.subr.bf16.mxu1 %v3318_v0 }
0x1cb4   :  { %v1504_v41 = vpop.f32.mrb[12].mxu1 }
0x1cb5   :  { %v1508_v43 = vadd.f32 %v1504_v41, %v232_v25  ;;  %v2731_v45 = vpop.f32.mrb[13].mxu1 }
0x1cb7   :  { %3097 = vtanh.f32 %v1508_v43  ;;  %v2383_v16 = vmul.f32 -1.442695, %v1508_v43 }
0x1cb9   :  { %3099 = vpow2.f32 %v2383_v16 }
0x1cc1   :  { %v3098_v46 = vpop.eup %3097 }
0x1cc2   :  { %1518 = vrot.lane.b32.xlu0 %v3098_v46, %s3321_s12 }
0x1cc3   :  { %v3100_v48 = vpop.eup %3099 }
0x1cc4   :  { %v1512_v49 = vadd.f32 1.0, %v3100_v48 }
0x1cc6   :  { %3101 = vrcp.f32 %v1512_v49 }
0x1cd0   :  { %v3102_v20 = vpop.eup %3101 }
0x1cd1   :  { %v1516_v53 = vmul.f32 %v3102_v20, %v3787_v40 }
0x1d34   :  { %v1519_v50 = vpop.permute.xlu0 %1518 }
0x1d35   :  { %v1521_v52 = vmul.f32 %v3102_v20, %v1519_v50 }
0x1d37   :  { %1523 = vrot.lane.b32.xlu1 %v1521_v52, %s3322_s13 }
0x1da9   :  { %v1524_v24 = vpop.permute.xlu1 %1523 }
0x1daa   :  { %v1526_v19 = vadd.f32 %v1524_v24, %v1516_v53 }
0x1dac   :  { %3103 = vtanh.f32 %v1526_v19 }
0x1db6   :  { %v3104_v54 = vpop.eup %3103 }
0x1db7   :  { %1529 = vrot.lane.b32.xlu0 %v3104_v54, %s3321_s12 }
0x1dbb   :  { %1537 = vrot.lane.b32.xlu0 %v3787_v40, %s3324_s0 }
0x1dbf   :  { %1621 = vrot.lane.b32.xlu0 %v3787_v40, %s3321_s12 }
0x1e29   :  { %v1530_v55 = vpop.permute.xlu0 %1529 }
0x1e2a   :  { %v1532_v57 = vmul.f32 %v3102_v20, %v1530_v55 }
0x1e2c   :  { %1534 = vrot.lane.b32.xlu1 %v1532_v57, %s3322_s13 }
0x1e2d   :  { %v1538_v58 = vpop.permute.xlu0 %1537 }
0x1e9e   :  { %v1535_v59 = vpop.permute.xlu1 %1534 }
0x1e9f   :  { %v1540_v61 = vsel %vm269_vm2, %v1535_v59, %v1538_v58  ;;  %v1649_v36 = vsel %vm269_vm2, %v1535_v59, %v1526_v19 }
0x1ea0   :  { %2749 = vmatmul.mubr.msk.f32.vlgmr.msra.gmra.mrb[14].mxu1 %vm115_vm1, %v1540_v61 }
0x1ea1   :  { %2975 = vmatpush3.bf16.msra.mxu1 %v3465_v12  ;;  %2789 = vmatprep.mubr.msk.f32.mxu1 %vm3319_vm0, %v3320_v1 }
0x1ea2   :  { %2976 = vmatprep.subr.bf16.mxu1 %v3318_v0 }
0x1ea5   :  { %2978 = vmatpush3.bf16.msra.mxu1 %v3469_v17  ;;  %v1652_v17 = vsel %vm1432_vm14, 1, %v3323_v60 }
0x1ea6   :  { %2979 = vmatprep.subr.bf16.mxu1 %v3318_v0 }
0x1f73   :  { %v1610_v62 = vpop.f32.mrb[14].mxu1 }
0x1f74   :  { %v1611_v63 = vadd.f32 %v3525_v56, %v1610_v62  ;;  %v2750_v2 = vpop.f32.mrb[15].mxu1  ;;  %v1622_v56 = vpop.permute.xlu0 %1621 }
0x1f76   :  { %3105 = vtanh.f32 %v1611_v63  ;;  %v2385_v5 = vmul.f32 -1.442695, %v1611_v63  ;;  %v3874_v63 = vld [vmem:[%s4068_s6] ss:$0 sm:$0xff] }
0x1f78   :  { %3107 = vpow2.f32 %v2385_v5 }
0x1f80   :  { %v3106_v4 = vpop.eup %3105 }
0x1f81   :  { %1626 = vrot.lane.b32.xlu1 %v3106_v4, %s3321_s12 }
0x1f82   :  { %v3108_v12 = vpop.eup %3107 }
0x1f83   :  { %v1617_v6 = vadd.f32 1.0, %v3108_v12 }
0x1f85   :  { %3109 = vrcp.f32 %v1617_v6 }
0x1f8f   :  { %v3110_v7 = vpop.eup %3109 }
0x1f90   :  { %v1624_v10 = vmul.f32 %v3110_v7, %v1622_v56  ;;  %v3147_v56 = vld [vmem:[%s4063_s1] sm:$0xff] }
0x1f91   :  { %vm1665_vm3 = vcmp.gt.s32.totalorder %v3147_v56, 6 }
0x1ff3   :  { %v1627_v8 = vpop.permute.xlu1 %1626 }
0x1ff4   :  { %v1629_v9 = vmul.f32 %v3110_v7, %v1627_v8 }
0x1ff6   :  { %1631 = vrot.lane.b32.xlu1 %v1629_v9, %s3322_s13 }
0x1ffa   :  { %1654 = vperm.xlu1 %3015, %v1652_v17  }
0x2068   :  { %v1632_v11 = vpop.permute.xlu1 %1631 }
0x2069   :  { %v1634_v18 = vadd.f32 %v1632_v11, %v1624_v10  ;;  %v1885_v10 = vsel %vm1665_vm3, 1, %v3323_v60 }
0x206b   :  { %3111 = vtanh.f32 %v1634_v18  ;;  %1646 = vrot.lane.b32.xlu1 %v1634_v18, %s3321_s12 }
0x2075   :  { %v3112_v29 = vpop.eup %3111 }
0x2076   :  { %1637 = vrot.lane.b32.xlu0 %v3112_v29, %s3321_s12 }
0x2079   :  { %v3831_v3 = vpop.permute.xlu1 %1654 }
0x207a   :  { %vm1656_vm15 = vcmp.eq.s32.totalorder %v3831_v3, 1 }
0x20dd   :  { %v1647_v37 = vpop.permute.xlu1 %1646 }
0x20e8   :  { %v1638_v22 = vpop.permute.xlu0 %1637 }
0x20e9   :  { %v3827_v33 = vmul.f32 %v3110_v7, %v1638_v22 }
0x20eb   :  { %1642 = vrot.lane.b32.xlu0 %v3827_v33, %s3324_s0 }
0x215d   :  { %v1643_v34 = vpop.permute.xlu0 %1642 }
0x215e   :  { %v1650_v38 = vsel %vm115_vm1, %v1649_v36, %v1643_v34 }
0x215f   :  { %v1651_v39 = vsel %vm486_vm4, %v1650_v38, %v1647_v37 }
0x2160   :  { %v3840_v25 = vsel %vm1656_vm15, %v1651_v39, %v3787_v40  ;;  %v3856_v40 = vld [vmem:[%s4066_s4] ss:$0 sm:$0xff] }
0x2161   :  { %2760 = vmatmul.mubr.msk.f32.vlgmr.msra.gmra.mrb[16].mxu0 %vm269_vm2, %v3840_v25  ;;  %v237_v41 = vadd.f32 %v3856_v40, %v3617_v23 }
0x2162   :  { %2963 = vmatpush3.bf16.msra.mxu0 %v3496_v42  ;;  %2778 = vmatprep.mubr.msk.f32.mxu0 %vm3319_vm0, %v3320_v1 }
0x2163   :  { %2964 = vmatprep.subr.bf16.mxu0 %v3318_v0 }
0x2166   :  { %2966 = vmatpush3.bf16.msra.mxu0 %v3499_v44 }
0x2167   :  { %2967 = vmatprep.subr.bf16.mxu0 %v3318_v0 }
0x216a   :  { %2969 = vmatpush3.bf16.msra.mxu0 %v3503_v47 }
0x216b   :  { %2970 = vmatprep.subr.bf16.mxu0 %v3318_v0 }
0x216e   :  { %2972 = vmatpush3.bf16.msra.mxu0 %v3508_v51 }
0x2234   :  { %v1737_v43 = vpop.f32.mrb[16].mxu0 }
0x2235   :  { %v1741_v45 = vadd.f32 %v1737_v43, %v237_v41  ;;  %v2761_v46 = vpop.f32.mrb[17].mxu0 }
0x2237   :  { %3113 = vtanh.f32 %v1741_v45  ;;  %v2387_v48 = vmul.f32 -1.442695, %v1741_v45 }
0x2239   :  { %3115 = vpow2.f32 %v2387_v48 }
0x2241   :  { %v3114_v16 = vpop.eup %3113 }
0x2242   :  { %1751 = vrot.lane.b32.xlu0 %v3114_v16, %s3321_s12 }
0x2243   :  { %v3116_v49 = vpop.eup %3115 }
0x2244   :  { %v1745_v20 = vadd.f32 1.0, %v3116_v49 }
0x2246   :  { %3117 = vrcp.f32 %v1745_v20 }
0x2250   :  { %v3118_v50 = vpop.eup %3117 }
0x2251   :  { %v1749_v24 = vmul.f32 %v3118_v50, %v3840_v25 }
0x22b4   :  { %v1752_v52 = vpop.permute.xlu0 %1751 }
0x22b5   :  { %v1754_v53 = vmul.f32 %v3118_v50, %v1752_v52 }
0x22b7   :  { %1756 = vrot.lane.b32.xlu1 %v1754_v53, %s3322_s13 }
0x2329   :  { %v1757_v23 = vpop.permute.xlu1 %1756 }
0x232a   :  { %v1759_v19 = vadd.f32 %v1757_v23, %v1749_v24  ;;  %v726_v23 = vsel %vm724_vm7, %v3605_v13, 0.0 }
0x232c   :  { %3119 = vtanh.f32 %v1759_v19 }
0x2336   :  { %v3120_v54 = vpop.eup %3119 }
0x2337   :  { %1762 = vrot.lane.b32.xlu0 %v3120_v54, %s3321_s12  ;;  %v1658_v54 = vsel %vm1656_vm15, %v3827_v33, 0.0 }
0x233b   :  { %1770 = vrot.lane.b32.xlu0 %v3840_v25, %s3324_s0 }
0x233f   :  { %1854 = vrot.lane.b32.xlu0 %v3840_v25, %s3321_s12 }
0x23a9   :  { %v1763_v55 = vpop.permute.xlu0 %1762 }
0x23aa   :  { %v1765_v57 = vmul.f32 %v3118_v50, %v1763_v55 }
0x23ac   :  { %1767 = vrot.lane.b32.xlu1 %v1765_v57, %s3322_s13 }
0x23ad   :  { %v1771_v58 = vpop.permute.xlu0 %1770 }
0x23b1   :  { %v1855_v11 = vpop.permute.xlu0 %1854 }
0x241e   :  { %v1768_v59 = vpop.permute.xlu1 %1767 }
0x241f   :  { %v1773_v61 = vsel %vm269_vm2, %v1768_v59, %v1771_v58  ;;  %v1882_v39 = vsel %vm269_vm2, %v1768_v59, %v1759_v19  ;;  %v1192_v19 = vsel %vm1190_vm11, %v3721_v30, 0.0 }
0x2420   :  { %2779 = vmatmul.mubr.msk.f32.vlgmr.msra.gmra.mrb[18].mxu0 %vm115_vm1, %v1773_v61 }
0x24f3   :  { %v1843_v62 = vpop.f32.mrb[18].mxu0 }
0x24f4   :  { %v1844_v2 = vadd.f32 %v3874_v63, %v1843_v62  ;;  %v2780_v4 = vpop.f32.mrb[19].mxu0 }
0x24f6   :  { %3121 = vtanh.f32 %v1844_v2  ;;  %v2389_v12 = vmul.f32 -1.442695, %v1844_v2 }
0x24f8   :  { %3123 = vpow2.f32 %v2389_v12 }
0x2500   :  { %v3122_v5 = vpop.eup %3121 }
0x2501   :  { %1859 = vrot.lane.b32.xlu1 %v3122_v5, %s3321_s12 }
0x2502   :  { %v3124_v6 = vpop.eup %3123 }
0x2503   :  { %v1850_v7 = vadd.f32 1.0, %v3124_v6 }
0x2505   :  { %3125 = vrcp.f32 %v1850_v7 }
0x250f   :  { %v3126_v8 = vpop.eup %3125 }
0x2510   :  { %v1857_v18 = vmul.f32 %v3126_v8, %v1855_v11 }
0x2573   :  { %v1860_v9 = vpop.permute.xlu1 %1859 }
0x2574   :  { %v1862_v17 = vmul.f32 %v3126_v8, %v1860_v9 }
0x2576   :  { %1864 = vrot.lane.b32.xlu1 %v1862_v17, %s3322_s13 }
0x257a   :  { %1887 = vperm.xlu1 %3015, %v1885_v10   ;;  %v2140_v10 = vld [vmem:[%s4069_s7 + $0x8] sm:$0xff] }
0x25e8   :  { %v1865_v29 = vpop.permute.xlu1 %1864 }
0x25e9   :  { %v1867_v22 = vadd.f32 %v1865_v29, %v1857_v18  ;;  %v2141_v18 = vld [vmem:[%s4069_s7 + $0x10] sm:$0xff]  ;;  %v2142_v29 = vld [vmem:[%s4069_s7 + $0x18] sm:$0xff] }
0x25eb   :  { %3127 = vtanh.f32 %v1867_v22  ;;  %1879 = vrot.lane.b32.xlu1 %v1867_v22, %s3321_s12  ;;  %v2995_v22 = vpack.c.bf16 %v2142_v29, %v2141_v18 }
0x25f5   :  { %v3128_v36 = vpop.eup %3127 }
0x25f6   :  { %1870 = vrot.lane.b32.xlu0 %v3128_v36, %s3321_s12 }
0x25f9   :  { %v3889_v38 = vpop.permute.xlu1 %1887 }
0x25fa   :  { %vm1889_vm6 = vcmp.eq.s32.totalorder %v3889_v38, 1 }
0x265d   :  { %v1880_v43 = vpop.permute.xlu1 %1879 }
0x2668   :  { %v1871_v34 = vpop.permute.xlu0 %1870 }
0x2669   :  { %v3885_v37 = vmul.f32 %v3126_v8, %v1871_v34  ;;  %v494_v34 = vsel %vm492_vm5, %v3541_v14, 0.0 }
0x266b   :  { %1875 = vrot.lane.b32.xlu0 %v3885_v37, %s3324_s0 }
0x26dd   :  { %v1876_v41 = vpop.permute.xlu0 %1875 }
0x26de   :  { %v1883_v45 = vsel %vm115_vm1, %v1882_v39, %v1876_v41  ;;  %v959_v39 = vsel %vm957_vm9, %v3668_v27, 0.0  ;;  %v1425_v41 = vsel %vm1423_vm13, %v3774_v32, 0.0 }
0x26df   :  { %v1884_v46 = vsel %vm486_vm4, %v1883_v45, %v1880_v43  ;;  %v1891_v43 = vsel %vm1889_vm6, %v3885_v37, 0.0 }
0x26e0   :  { %v3898_v16 = vsel %vm1889_vm6, %v1884_v46, %v3840_v25  ;;  %v242_v25 = vadd.f32 %v3856_v40, %v3615_v21 }
0x26e1   :  { %2790 = vmatmul.mubr.msk.f32.vlgmr.msra.gmra.mrb[16].mxu1 %vm269_vm2, %v3898_v16 }
0x26e2   :  { %2981 = vmatpush3.bf16.msra.mxu1 %v3496_v42  ;;  %2808 = vmatprep.mubr.msk.f32.mxu1 %vm3319_vm0, %v3320_v1  ;;  %vm1898_vm0 = vcmp.gt.s32.totalorder %v3147_v56, 7 }
0x26e3   :  { %2982 = vmatprep.subr.bf16.mxu1 %v3318_v0  ;;  %v2118_v24 = vsel %vm1898_vm0, 1, %v3323_v60 }
0x26e6   :  { %2984 = vmatpush3.bf16.msra.mxu1 %v3499_v44 }
0x26e7   :  { %2985 = vmatprep.subr.bf16.mxu1 %v3318_v0 }
0x26ea   :  { %2987 = vmatpush3.bf16.msra.mxu1 %v3503_v47 }
0x26eb   :  { %2988 = vmatprep.subr.bf16.mxu1 %v3318_v0 }
0x26ee   :  { %2990 = vmatpush3.bf16.msra.mxu1 %v3508_v51 }
0x27b4   :  { %v1970_v48 = vpop.f32.mrb[16].mxu1 }
0x27b5   :  { %v1974_v42 = vadd.f32 %v1970_v48, %v242_v25  ;;  %v2791_v49 = vpop.f32.mrb[17].mxu1 }
0x27b7   :  { %3129 = vtanh.f32 %v1974_v42  ;;  %v2391_v20 = vmul.f32 -1.442695, %v1974_v42 }
0x27b9   :  { %3131 = vpow2.f32 %v2391_v20 }
0x27c1   :  { %v3130_v1 = vpop.eup %3129 }
0x27c2   :  { %1984 = vrot.lane.b32.xlu0 %v3130_v1, %s3321_s12 }
0x27c3   :  { %v3132_v44 = vpop.eup %3131 }
0x27c4   :  { %v1978_v50 = vadd.f32 1.0, %v3132_v44 }
0x27c6   :  { %3133 = vrcp.f32 %v1978_v50 }
0x27d0   :  { %v3134_v47 = vpop.eup %3133 }
0x27d1   :  { %v1982_v51 = vmul.f32 %v3134_v47, %v3898_v16 }
0x2834   :  { %v1985_v52 = vpop.permute.xlu0 %1984 }
0x2835   :  { %v1987_v0 = vmul.f32 %v3134_v47, %v1985_v52 }
0x2837   :  { %1989 = vrot.lane.b32.xlu1 %v1987_v0, %s3322_s13 }
0x28a9   :  { %v1990_v21 = vpop.permute.xlu1 %1989 }
0x28aa   :  { %v3916_v40 = vadd.f32 %v1990_v21, %v1982_v51  ;;  %v2394_v21 = vld [vmem:[%s4070_s8] ss:$0 sm:$0xff]  ;;  %s3326_s8 = smov [#allocation15]  }
0x28ac   :  { %3135 = vtanh.f32 %v3916_v40 }
0x28b6   :  { %v3136_v53 = vpop.eup %3135 }
0x28b7   :  { %1995 = vrot.lane.b32.xlu0 %v3136_v53, %s3321_s12 }
0x28bb   :  { %2003 = vrot.lane.b32.xlu0 %v3898_v16, %s3324_s0 }
0x28bf   :  { %2087 = vrot.lane.b32.xlu0 %v3898_v16, %s3321_s12 }
0x28c3   :  { %2120 = vperm.xlu0 %3016, %v2118_v24  }
0x28c7   :  { %728 = vrot.lane.b32.xlu0 %v726_v23, %s3322_s13 }
0x28cb   :  { %1194 = vrot.lane.b32.xlu0 %v1192_v19, %s3322_s13 }
0x28cf   :  { %1660 = vrot.lane.b32.xlu0 %v1658_v54, %s3322_s13 }
0x2929   :  { %v1996_v60 = vpop.permute.xlu0 %1995 }
0x292a   :  { %v1998_v55 = vmul.f32 %v3134_v47, %v1996_v60 }
0x292c   :  { %2000 = vrot.lane.b32.xlu1 %v1998_v55, %s3322_s13 }
0x292d   :  { %v2004_v26 = vpop.permute.xlu0 %2003 }
0x2931   :  { %v2088_v13 = vpop.permute.xlu0 %2087 }
0x2942   :  { %v3938_v57 = vpop.permute.xlu0 %2120 }
0x2943   :  { %vm2122_vm5 = vcmp.eq.s32.totalorder %v3938_v57, 1 }
0x2946   :  { %v729_v58 = vpop.permute.xlu0 %728 }
0x2947   :  { %732 = vst.msk [vmem:[#allocation3 + $0x8] sm:$0xff] %vm269_vm2, %v729_v58 }
0x294a   :  { %v1195_v30 = vpop.permute.xlu0 %1194 }
0x294b   :  { %1198 = vst.msk [vmem:[#allocation3 + $0x18] sm:$0xff] %vm269_vm2, %v1195_v30 }
0x294e   :  { %v1661_v31 = vpop.permute.xlu0 %1660  ;;  %v2132_v38 = vld [vmem:[#allocation3 + $0x8] sm:$0xff] }
0x294f   :  { %1664 = vst.msk [vmem:[#allocation3 + $0x28] sm:$0xff] %vm269_vm2, %v1661_v31 }
0x2952   :  { %v2134_v25 = vld [vmem:[#allocation3 + $0x18] sm:$0xff] }
0x2956   :  { %v2136_v42 = vld [vmem:[#allocation3 + $0x28] sm:$0xff] }
0x299e   :  { %v3943_v33 = vpop.permute.xlu1 %2000 }
0x299f   :  { %v2006_v3 = vsel %vm269_vm2, %v3943_v33, %v2004_v26  ;;  %v2115_v44 = vsel %vm269_vm2, %v3943_v33, %v3916_v40 }
0x29a0   :  { %2809 = vmatmul.mubr.msk.f32.vlgmr.msra.gmra.mrb[18].mxu1 %vm115_vm1, %v2006_v3 }
0x2a73   :  { %v2076_v59 = vpop.f32.mrb[18].mxu1 }
0x2a74   :  { %v2077_v61 = vadd.f32 %v3874_v63, %v2076_v59  ;;  %v2810_v62 = vpop.f32.mrb[19].mxu1  ;;  %v2139_v63 = vld [vmem:[%s4069_s7] sm:$0xff] }
0x2a75   :  { %v2991_v11 = vpack.c.bf16 %v2140_v10, %v2139_v63 }
0x2a76   :  { %3137 = vtanh.f32 %v2077_v61  ;;  %v2393_v4 = vmul.f32 -1.442695, %v2077_v61 }
0x2a77   :  { %2992 = vmatprep.subr.bf16.mxu0 %v2991_v11 }
0x2a78   :  { %3139 = vpow2.f32 %v2393_v4  ;;  %2994 = vmatpush3.bf16.msra.mxu0 %v2991_v11 }
0x2a79   :  { %2996 = vmatprep.subr.bf16.mxu0 %v2995_v22 }
0x2a7c   :  { %2998 = vmatpush3.bf16.msra.mxu0 %v2995_v22 }
0x2a80   :  { %v3138_v2 = vpop.eup %3137 }
0x2a81   :  { %2092 = vrot.lane.b32.xlu1 %v3138_v2, %s3321_s12 }
0x2a82   :  { %v3140_v5 = vpop.eup %3139 }
0x2a83   :  { %v2083_v12 = vadd.f32 1.0, %v3140_v5 }
0x2a85   :  { %3141 = vrcp.f32 %v2083_v12 }
0x2a8f   :  { %v3142_v6 = vpop.eup %3141 }
0x2a90   :  { %v2090_v9 = vmul.f32 %v3142_v6, %v2088_v13 }
0x2af3   :  { %v2093_v7 = vpop.permute.xlu1 %2092 }
0x2af4   :  { %v2095_v8 = vmul.f32 %v3142_v6, %v2093_v7 }
0x2af6   :  { %2097 = vrot.lane.b32.xlu1 %v2095_v8, %s3322_s13 }
0x2b68   :  { %v2098_v17 = vpop.permute.xlu1 %2097 }
0x2b69   :  { %v2100_v56 = vadd.f32 %v2098_v17, %v2090_v9 }
0x2b6b   :  { %3143 = vtanh.f32 %v2100_v56 }
0x2b75   :  { %v3144_v36 = vpop.eup %3143 }
0x2b76   :  { %2103 = vrot.lane.b32.xlu1 %v3144_v36, %s3321_s12 }
0x2b7a   :  { %496 = vrot.lane.b32.xlu1 %v494_v34, %s3322_s13 }
0x2b7e   :  { %961 = vrot.lane.b32.xlu1 %v959_v39, %s3322_s13 }
0x2b82   :  { %1427 = vrot.lane.b32.xlu1 %v1425_v41, %s3322_s13 }
0x2b86   :  { %1893 = vrot.lane.b32.xlu1 %v1891_v43, %s3322_s13 }
0x2be8   :  { %v2104_v14 = vpop.permute.xlu1 %2103 }
0x2be9   :  { %v2106_v15 = vmul.f32 %v3142_v6, %v2104_v14 }
0x2beb   :  { %v2124_v27 = vsel %vm2122_vm5, %v2106_v15, 0.0  ;;  %2108 = vrot.lane.b32.xlu1 %v2106_v15, %s3324_s0 }
0x2bec   :  { %2126 = vrot.lane.b32.xlu0 %v2124_v27, %s3322_s13  ;;  %v497_v28 = vpop.permute.xlu1 %496 }
0x2bed   :  { %499 = vst.msk [vmem:[#allocation3] sm:$0xff] %vm269_vm2, %v497_v28 }
0x2bf0   :  { %2112 = vrot.lane.b32.xlu0 %v2100_v56, %s3321_s12  ;;  %v962_v32 = vpop.permute.xlu1 %961 }
0x2bf1   :  { %965 = vst.msk [vmem:[#allocation3 + $0x10] sm:$0xff] %vm269_vm2, %v962_v32 }
0x2bf4   :  { %v1428_v35 = vpop.permute.xlu1 %1427  ;;  %v2131_v37 = vld [vmem:[#allocation3] sm:$0xff] }
0x2bf5   :  { %1431 = vst.msk [vmem:[#allocation3 + $0x20] sm:$0xff] %vm269_vm2, %v1428_v35  ;;  %2819 = vmatprep.mubr.msk.f32.mxu0 %vm269_vm2, %v2131_v37 }
0x2bf6   :  { %2820 = vmatmul.mubr.msk.f32.vlgmr.msra.gmra.mrb[20].mxu0 %vm269_vm2, %v2132_v38 }
0x2bf8   :  { %v1894_v45 = vpop.permute.xlu1 %1893  ;;  %v2133_v46 = vld [vmem:[#allocation3 + $0x10] sm:$0xff] }
0x2bf9   :  { %1897 = vst.msk [vmem:[#allocation3 + $0x30] sm:$0xff] %vm269_vm2, %v1894_v45  ;;  %2822 = vmatprep.mubr.msk.f32.mxu0 %vm269_vm2, %v2133_v46 }
0x2bfa   :  { %2823 = vmatmul.mubr.msk.f32.gmra.mrb[22].mxu0 %vm269_vm2, %v2134_v25 }
0x2bfc   :  { %v2135_v48 = vld [vmem:[#allocation3 + $0x20] sm:$0xff] }
0x2bfd   :  { %2825 = vmatprep.mubr.msk.f32.mxu0 %vm269_vm2, %v2135_v48 }
0x2bfe   :  { %2826 = vmatmul.mubr.msk.f32.gmra.mrb[24].mxu0 %vm269_vm2, %v2136_v42 }
0x2c00   :  { %v2137_v49 = vld [vmem:[#allocation3 + $0x30] sm:$0xff] }
0x2c01   :  { %2828 = vmatprep.mubr.msk.f32.mxu0 %vm269_vm2, %v2137_v49 }
0x2c5d   :  { %v2109_v20 = vpop.permute.xlu1 %2108 }
0x2c5e   :  { %v2127_v1 = vpop.permute.xlu0 %2126  ;;  %v2116_v50 = vsel %vm115_vm1, %v2115_v44, %v2109_v20 }
0x2c5f   :  { %2130 = vst.msk [vmem:[#allocation3 + $0x38] sm:$0xff] %vm269_vm2, %v2127_v1 }
0x2c62   :  { %v2113_v47 = vpop.permute.xlu0 %2112 }
0x2c63   :  { %v2117_v52 = vsel %vm486_vm4, %v2116_v50, %v2113_v47 }
0x2c64   :  { %v2123_v0 = vsel %vm2122_vm5, %v2117_v52, %v3898_v16 }
0x2c65   :  { %2294 = vrot.lane.b32.xlu0 %v2123_v0, %s3324_s0  ;;  %2287 = vst.msk [vmem:[#allocation13] sm:$0xff] %vm269_vm2, %v2123_v0  ;;  %2289 = vrot.lane.b32.xlu1 %v2123_v0, %s3321_s12  ;;  %s2332_s12 = sshll.u32 %s3326_s8, 4  ;;  %s2333_s12 = int_to_ptr.vmem [resolvable:$true] %s2332_s12 }
0x2c66   :  { %v2138_v51 = vld [vmem:[#allocation3 + $0x38] sm:$0xff] }
0x2c67   :  { %2829 = vmatmul.mubr.msk.f32.gmra.mrb[26].mxu0 %vm269_vm2, %v2138_v51 }
0x2c69   :  { %2298 = vrot.lane.b32.xlu1 %v2123_v0, %s3322_s13  ;;  %s3236_s13 = scalar_lea.vmem %s2321_s27, 256 }
0x2c6a   :  { %p3237_p4 = scmp.ne.s32.totalorder %s2321_s27, %s3236_s13  ;;  %p3242_p6 = scmp.lt.s32.totalorder %s3236_s13, %s3236_s13 }
0x2c6c   :  { %p3243_p7 = por %p3242_p6, %p3241_p5 }
0x2c6e   :  { %p3244_p8 = pnand %p3243_p7, %p3237_p4 }
0x2cc9   :  { %v2821_v40 = vpop.f32.mrb[20].mxu0 }
0x2cca   :  { %v2246_v53 = vadd.f32 %v2821_v40, %v2394_v21  ;;  %v2240_v24 = vpop.f32.mrb[21].mxu0 }
0x2ccb   :  { %v2241_v23 = vadd.f32 %v2394_v21, %v2240_v24 }
0x2ccc   :  { %2280 = vst [vmem:[#allocation12 + $0x8] sm:$0xff] %v2246_v53 }
0x2ccd   :  { %2279 = vst [vmem:[#allocation12] sm:$0xff] %v2241_v23  ;;  %v2824_v16 = vpop.f32.mrb[22].mxu0 }
0x2cce   :  { %v2256_v19 = vadd.f32 %v2824_v16, %v2394_v21  ;;  %v2250_v54 = vpop.f32.mrb[23].mxu0 }
0x2ccf   :  { %v2251_v60 = vadd.f32 %v2394_v21, %v2250_v54 }
0x2cd0   :  { %2282 = vst [vmem:[#allocation12 + $0x18] sm:$0xff] %v2256_v19 }
0x2cd1   :  { %2281 = vst [vmem:[#allocation12 + $0x10] sm:$0xff] %v2251_v60  ;;  %v2827_v55 = vpop.f32.mrb[24].mxu0 }
0x2cd2   :  { %v2266_v26 = vadd.f32 %v2827_v55, %v2394_v21  ;;  %v2260_v13 = vpop.f32.mrb[25].mxu0 }
0x2cd3   :  { %v2261_v57 = vadd.f32 %v2394_v21, %v2260_v13 }
0x2cd4   :  { %2284 = vst [vmem:[#allocation12 + $0x28] sm:$0xff] %v2266_v26 }
0x2cd5   :  { %2283 = vst [vmem:[#allocation12 + $0x20] sm:$0xff] %v2261_v57 }
0x2cd7   :  { %v2295_v58 = vpop.permute.xlu0 %2294  ;;  %v2290_v30 = vpop.permute.xlu1 %2289 }
0x2cd8   :  { %2297 = vst.msk [vmem:[#allocation15] sm:$0xff] %vm269_vm2, %v2295_v58  ;;  %2293 = vst.msk [vmem:[#allocation13 + $0x8] sm:$0xff] %vm269_vm2, %v2290_v30 }
0x2cd9   :  { %3247 = shalt.err (!%p3244_p8)
}
0x2cda   :  { %s3248_s16 = scalar_lea.hbm %s4072_s10, 256 }
0x2cdb   :  { %p3249_p9 = scmp.ne.s32.totalorder %s4072_s10, %s3248_s16  ;;  %p3252_p10 = scmp.lt.u32.totalorder %s3248_s16, %s4072_s10 }
0x2cdd   :  { %p3254_p11 = pnand %p3252_p10, %p3249_p9 }
0x2cdf   :  { %3257 = shalt.err (!%p3254_p11)
}
0x2ce0   :  { %2326 = dma.vmem_to_hbm [thread:$0]  %s2321_s27, 256, %s4072_s10, [#allocation14], %s3314_s29, %s3314_s29, %s3315_s30   ;;  %v2299_v31 = vpop.permute.xlu1 %2298 }
0x2ce1   :  { %2302 = vst.msk [vmem:[#allocation15 + $0x8] sm:$0xff] %vm269_vm2, %v2299_v31  ;;  %s3258_s22 = scalar_lea.vmem %s2333_s12, 256  ;;  %p3263_p13 = scmp.lt.s32.totalorder %s2333_s12, %s2333_s12 }
0x2ce2   :  { %p3259_p12 = scmp.ne.s32.totalorder %s2333_s12, %s3258_s22  ;;  %p3264_p0 = scmp.lt.s32.totalorder %s3258_s22, %s3258_s22 }
0x2ce4   :  { %p3265_p1 = por %p3264_p0, %p3263_p13 }
0x2ce6   :  { %p3266_p2 = pnand %p3265_p1, %p3259_p12 }
0x2ce8   :  { %3269 = shalt.err (!%p3266_p2)
}
0x2ce9   :  { %s3270_s6 = scalar_lea.hbm %s4073_s11, 256 }
0x2cea   :  { %p3271_p3 = scmp.ne.s32.totalorder %s4073_s11, %s3270_s6  ;;  %p3274_p4 = scmp.lt.u32.totalorder %s3270_s6, %s4073_s11 }
0x2cec   :  { %p3276_p5 = pnand %p3274_p4, %p3271_p3 }
0x2cee   :  { %3279 = shalt.err (!%p3276_p5)
}
0x2cef   :  { %2338 = dma.vmem_to_hbm [thread:$0]  %s2333_s12, 256, %s4073_s11, [#allocation14], %s3314_s29, %s3314_s29, %s3315_s30  }
0x2cf0   :  { %s3327_s3 = smov [#allocation12]  }
0x2cf1   :  { %s2308_s7 = sshll.u32 %s3327_s3, 4  ;;  %s2309_s7 = int_to_ptr.vmem [resolvable:$true] %s2308_s7 }
0x2cf2   :  { %s3280_s25 = scalar_lea.vmem %s2309_s7, 1024  ;;  %p3285_p7 = scmp.lt.s32.totalorder %s2309_s7, %s2309_s7 }
0x2cf3   :  { %p3281_p6 = scmp.ne.s32.totalorder %s2309_s7, %s3280_s25  ;;  %p3286_p8 = scmp.lt.s32.totalorder %s3280_s25, %s3280_s25 }
0x2cf5   :  { %p3287_p9 = por %p3286_p8, %p3285_p7 }
0x2cf7   :  { %p3288_p10 = pnand %p3287_p9, %p3281_p6 }
0x2d3a   :  { %v2830_v33 = vpop.f32.mrb[26].mxu0 }
0x2d3b   :  { %v2276_v3 = vadd.f32 %v2830_v33, %v2394_v21  ;;  %v2270_v59 = vpop.f32.mrb[27].mxu0 }
0x2d3c   :  { %v2271_v61 = vadd.f32 %v2394_v21, %v2270_v59 }
0x2d3d   :  { %2286 = vst [vmem:[#allocation12 + $0x38] sm:$0xff] %v2276_v3 }
0x2d3e   :  { %2285 = vst [vmem:[#allocation12 + $0x30] sm:$0xff] %v2271_v61 }
0x2d3f   :  { %3291 = shalt.err (!%p3288_p10)
}
0x2d40   :  { %s3292_s11 = scalar_lea.hbm %s4071_s9, 1024 }
0x2d41   :  { %p3293_p11 = scmp.ne.s32.totalorder %s4071_s9, %s3292_s11  ;;  %p3296_p12 = scmp.lt.u32.totalorder %s3292_s11, %s4071_s9 }
0x2d43   :  { %p3298_p13 = pnand %p3296_p12, %p3293_p11 }
0x2d45   :  { %3301 = shalt.err (!%p3298_p13)
}
0x2d46   :  { %2314 = dma.vmem_to_hbm [thread:$0]  %s2309_s7, 1024, %s4071_s9, [#allocation6], %s3314_s29, %s3314_s29, %s3315_s30  }
0x2d47   :  { %3308 = dma.done.wait [#allocation6], 1024  }
0x2d48   :  { %3309 = vsyncadd [#allocation6], 4294966272 }
0x2d49   :  { %3310 = dma.done.wait [#allocation14], 512  }
0x2d4a   :  { %3311 = vsyncadd [#allocation14], 4294966784 }
0x2d4b   :  { %2348 = vsyncpa [#allocation5], 1 }
0x2d4c   :  { %2349 = vsyncpa [#allocation8], 1 }
0x2d4d   :  { %2350 = vsyncpa [#allocation11], 1 }
0x2d4e   :  { %2351 = vsyncpa [#allocation6], 1 }
0x2d4f   :  { %2352 = vsyncpa [#allocation14], 1 }

</bundles_post_ra>
